<compile_context>
chip_gen: v5e
topology: v5e:2x2
jax: 0.10.0
libtpu: 0.0.40
codegen_flags: <defaults>
</compile_context>

<pallas_src>
import functools

import jax
import jax.numpy as jnp
from jax import lax
from jax.experimental import pallas as pl
from jax.experimental.pallas import tpu as pltpu


_VMEM_LIMIT = 64 * 1024 * 1024   # <= physical VMEM on v7x, below scoped max on v5e/v6e


def _pick_tile(dim, preferred, quantum):
    """Largest tile <= preferred that divides dim and is a multiple of quantum.

    Falls back to the full dim (a full-extent block is always legal)."""
    if dim <= preferred:
        return dim
    t = (preferred // quantum) * quantum
    while t >= quantum:
        if dim % t == 0:
            return t
        t -= quantum
    return dim


# --------------------- matmul + bias (+ GELU) kernel -------------------------

def _mm_bias_kernel(x_ref, w_ref, b_ref, o_ref, acc_ref, *, activation):
    @pl.when(pl.program_id(2) == 0)
    def _():
        acc_ref[...] = jnp.zeros_like(acc_ref)

    acc_ref[...] += jnp.dot(x_ref[...], w_ref[...],
                            preferred_element_type=jnp.float32)

    @pl.when(pl.program_id(2) == pl.num_programs(2) - 1)
    def _():
        y = acc_ref[...] + b_ref[...]
        if activation == "gelu":
            # tanh-approx GELU (BERT reference uses erf GELU; numerically close).
            # TODO(synk): switch to exact erf GELU if lax.erf lowering is required.
            c = 0.7978845608028654  # sqrt(2/pi)
            y = 0.5 * y * (1.0 + jnp.tanh(c * (y + 0.044715 * y * y * y)))
        o_ref[...] = y.astype(o_ref.dtype)


def fused_matmul_bias(x, w, b, *, activation=None, out_dtype=jnp.bfloat16,
                      tm=256, tn=512, tk=256):
    M, K = x.shape
    _, N = w.shape
    tm = _pick_tile(M, tm, 16)
    tn = _pick_tile(N, tn, 128)
    tk = _pick_tile(K, tk, 128)
    grid = (M // tm, N // tn, K // tk)
    return pl.pallas_call(
        functools.partial(_mm_bias_kernel, activation=activation),
        out_shape=jax.ShapeDtypeStruct((M, N), out_dtype),
        grid=grid,
        in_specs=[
            pl.BlockSpec((tm, tk), lambda i, j, k: (i, k)),
            pl.BlockSpec((tk, tn), lambda i, j, k: (k, j)),
            pl.BlockSpec((1, tn), lambda i, j, k: (0, j)),
        ],
        out_specs=pl.BlockSpec((tm, tn), lambda i, j, k: (i, j)),
        scratch_shapes=[pltpu.VMEM((tm, tn), jnp.float32)],
        compiler_params=pltpu.CompilerParams(
            dimension_semantics=("parallel", "parallel", "arbitrary"),
            vmem_limit_bytes=_VMEM_LIMIT),
    )(x, w, b)


# ------------- matmul + bias + residual + LayerNorm fused kernel -------------
# N (= hidden) is kept whole so the LayerNorm epilogue sees a full row.

def _mm_res_ln_kernel(x_ref, w_ref, b_ref, r_ref, g_ref, beta_ref, o_ref,
                      acc_ref, *, eps):
    @pl.when(pl.program_id(1) == 0)
    def _():
        acc_ref[...] = jnp.zeros_like(acc_ref)

    acc_ref[...] += jnp.dot(x_ref[...], w_ref[...],
                            preferred_element_type=jnp.float32)

    @pl.when(pl.program_id(1) == pl.num_programs(1) - 1)
    def _():
        y = acc_ref[...] + b_ref[...] + r_ref[...].astype(jnp.float32)
        mean = jnp.mean(y, axis=-1, keepdims=True)
        var = jnp.mean(jnp.square(y - mean), axis=-1, keepdims=True)
        inv = lax.rsqrt(var + eps)
        o_ref[...] = (((y - mean) * inv) * g_ref[...]
                      + beta_ref[...]).astype(o_ref.dtype)


def fused_matmul_residual_ln(x, w, b, residual, gamma, beta, *, eps=1e-12,
                             out_dtype=jnp.bfloat16, tm=256, tk=256):
    M, K = x.shape
    _, N = w.shape
    tm = _pick_tile(M, tm, 16)
    tk = _pick_tile(K, tk, 128)
    grid = (M // tm, K // tk)
    return pl.pallas_call(
        functools.partial(_mm_res_ln_kernel, eps=eps),
        out_shape=jax.ShapeDtypeStruct((M, N), out_dtype),
        grid=grid,
        in_specs=[
            pl.BlockSpec((tm, tk), lambda i, k: (i, k)),
            pl.BlockSpec((tk, N), lambda i, k: (k, 0)),
            pl.BlockSpec((1, N), lambda i, k: (0, 0)),
            pl.BlockSpec((tm, N), lambda i, k: (i, 0)),
            pl.BlockSpec((1, N), lambda i, k: (0, 0)),
            pl.BlockSpec((1, N), lambda i, k: (0, 0)),
        ],
        out_specs=pl.BlockSpec((tm, N), lambda i, k: (i, 0)),
        scratch_shapes=[pltpu.VMEM((tm, N), jnp.float32)],
        compiler_params=pltpu.CompilerParams(
            dimension_semantics=("parallel", "arbitrary"),
            vmem_limit_bytes=_VMEM_LIMIT),
    )(x, w, b, residual, gamma, beta)


# ----------------------- LayerNorm (embeddings, no residual) -----------------

def _ln_kernel(x_ref, g_ref, b_ref, o_ref, *, eps):
    x = x_ref[...].astype(jnp.float32)
    mean = jnp.mean(x, axis=-1, keepdims=True)
    var = jnp.mean(jnp.square(x - mean), axis=-1, keepdims=True)
    inv = lax.rsqrt(var + eps)
    o_ref[...] = (((x - mean) * inv) * g_ref[...] + b_ref[...]).astype(o_ref.dtype)


def layernorm(x, gamma, beta, *, eps=1e-12, out_dtype=jnp.bfloat16, tm=512):
    M, H = x.shape
    tm = _pick_tile(M, tm, 8)
    return pl.pallas_call(
        functools.partial(_ln_kernel, eps=eps),
        out_shape=jax.ShapeDtypeStruct((M, H), out_dtype),
        grid=(M // tm,),
        in_specs=[
            pl.BlockSpec((tm, H), lambda i: (i, 0)),
            pl.BlockSpec((1, H), lambda i: (0, 0)),
            pl.BlockSpec((1, H), lambda i: (0, 0)),
        ],
        out_specs=pl.BlockSpec((tm, H), lambda i: (i, 0)),
        compiler_params=pltpu.CompilerParams(
            dimension_semantics=("parallel",),
            vmem_limit_bytes=_VMEM_LIMIT),
    )(x, gamma, beta)


# --------------------------- multi-head attention ----------------------------
# One grid step = one batch element, all heads; input is the fused QKV slab in
# (B, S, 3H) layout and the output is written lane-dense in (B, S, H) layout,
# so no XLA head-split / head-merge transposes are needed.
# TODO(synk): pack pairs of dh=64 heads per contraction for full 128-lane MXU
# utilization at real BERT head sizes.

def _attn_kernel(qkv_ref, mask_ref, o_ref, *, num_heads, head_dim):
    H = num_heads * head_dim
    qkv = qkv_ref[0]                      # (S, 3H) bf16
    mask = mask_ref[0]                    # (1, S)  f32 additive mask
    scale = 1.0 / float(head_dim) ** 0.5
    ctx_heads = []
    for h in range(num_heads):
        lo = h * head_dim
        q_h = qkv[:, lo:lo + head_dim]                    # (S, dh)
        k_h = qkv[:, H + lo:H + lo + head_dim]            # (S, dh)
        v_h = qkv[:, 2 * H + lo:2 * H + lo + head_dim]    # (S, dh)
        s = lax.dot_general(q_h, k_h, (((1,), (1,)), ((), ())),
                            preferred_element_type=jnp.float32)
        s = s * scale + mask                              # (S, S) + (1, S)
        s = s - jnp.max(s, axis=-1, keepdims=True)
        p = jnp.exp(s)
        p = p * pl.reciprocal(jnp.sum(p, axis=-1, keepdims=True), approx=True)
        ctx_heads.append(jnp.dot(p.astype(v_h.dtype), v_h,
                                 preferred_element_type=jnp.float32))
    o_ref[0] = jnp.concatenate(ctx_heads, axis=-1).astype(o_ref.dtype)


def attention(qkv, add_mask, *, num_heads):
    B, S, H3 = qkv.shape
    H = H3 // 3
    dh = H // num_heads
    return pl.pallas_call(
        functools.partial(_attn_kernel, num_heads=num_heads, head_dim=dh),
        out_shape=jax.ShapeDtypeStruct((B, S, H), jnp.bfloat16),
        grid=(B,),
        in_specs=[
            pl.BlockSpec((1, S, H3), lambda b: (b, 0, 0)),
            pl.BlockSpec((1, 1, S), lambda b: (b, 0, 0)),
        ],
        out_specs=pl.BlockSpec((1, S, H), lambda b: (b, 0, 0)),
        compiler_params=pltpu.CompilerParams(
            dimension_semantics=("parallel",),
            vmem_limit_bytes=_VMEM_LIMIT),
    )(qkv, add_mask)


# ------------------------- classifier head (fused) ---------------------------
# Tiny path: single kernel, label dim padded to 128 for lane-dense stores,
# optional masked softmax fused in; sliced back to num_labels outside.

def _classifier_kernel(x_ref, w_ref, b_ref, o_ref, *, num_labels, apply_softmax):
    y = jnp.dot(x_ref[...], w_ref[...], preferred_element_type=jnp.float32)
    y = y + b_ref[...]
    if apply_softmax:
        cols = lax.broadcasted_iota(jnp.int32, y.shape, 1)
        y = jnp.where(cols < num_labels, y, -1e30)
        y = y - jnp.max(y, axis=-1, keepdims=True)
        e = jnp.exp(y)
        y = e / jnp.sum(e, axis=-1, keepdims=True)   # exact divide: tiny, asserted
    o_ref[...] = y


def classifier_head(x, w, b, *, num_labels, apply_softmax):
    Bv, H = x.shape
    n_pad = ((num_labels + 127) // 128) * 128
    w_p = jnp.zeros((H, n_pad), w.dtype).at[:, :num_labels].set(w)
    b_p = jnp.zeros((1, n_pad), jnp.float32).at[:, :num_labels].set(b)
    out = pl.pallas_call(
        functools.partial(_classifier_kernel, num_labels=num_labels,
                          apply_softmax=apply_softmax),
        out_shape=jax.ShapeDtypeStruct((Bv, n_pad), jnp.float32),
        in_specs=[
            pl.BlockSpec((Bv, H), lambda: (0, 0)),
            pl.BlockSpec((H, n_pad), lambda: (0, 0)),
            pl.BlockSpec((1, n_pad), lambda: (0, 0)),
        ],
        out_specs=pl.BlockSpec((Bv, n_pad), lambda: (0, 0)),
        compiler_params=pltpu.CompilerParams(vmem_limit_bytes=_VMEM_LIMIT),
    )(x, w_p, b_p)
    return out[:, :num_labels]


# ------------------------------ model wrapper --------------------------------

def init_params(key, *, vocab=100, max_pos=64, type_vocab=2, hidden=32,
                num_heads=4, num_layers=2, intermediate=64, num_labels=3):
    std = 0.02
    ks = iter(jax.random.split(key, 8 + num_layers * 16))

    def w(shape, dtype=jnp.bfloat16):
        return (jax.random.normal(next(ks), shape, jnp.float32) * std).astype(dtype)

    def zeros(shape):
        return jnp.zeros(shape, jnp.float32)

    def ones(shape):
        return jnp.ones(shape, jnp.float32)

    layers = []
    for _ in range(num_layers):
        wq, wk, wv = w((hidden, hidden)), w((hidden, hidden)), w((hidden, hidden))
        layers.append(dict(
            w_qkv=jnp.concatenate([wq, wk, wv], axis=1),    # fused (H, 3H)
            b_qkv=zeros((1, 3 * hidden)),
            wo=w((hidden, hidden)), bo=zeros((1, hidden)),
            ln1_g=ones((1, hidden)), ln1_b=zeros((1, hidden)),
            wi=w((hidden, intermediate)), bi=zeros((1, intermediate)),
            wf=w((intermediate, hidden)), bf=zeros((1, hidden)),
            ln2_g=ones((1, hidden)), ln2_b=zeros((1, hidden)),
        ))

    return dict(
        word_emb=w((vocab, hidden), jnp.float32),
        pos_emb=w((max_pos, hidden), jnp.float32),
        type_emb=w((type_vocab, hidden), jnp.float32),
        emb_ln_g=ones((1, hidden)), emb_ln_b=zeros((1, hidden)),
        fc_w=w((hidden, num_labels)), fc_b=zeros((1, num_labels)),
        layers=layers,
    ), num_heads


@functools.partial(jax.jit, static_argnames=("num_heads", "mode"))
def bert_classification(params, input_ids, attention_mask, token_type_ids,
                        *, num_heads, mode="train"):
    B, S = input_ids.shape
    H = params["word_emb"].shape[1]
    num_labels = params["fc_w"].shape[1]

    # --- embeddings: gathers + sum are XLA glue; LayerNorm runs in a kernel ---
    we = jnp.take(params["word_emb"], input_ids, axis=0)          # (B,S,H)
    pe = params["pos_emb"][:S][None, :, :]                        # (1,S,H)
    te = jnp.take(params["type_emb"], token_type_ids, axis=0)     # (B,S,H)
    emb = (we + pe + te).reshape(B * S, H)
    h = layernorm(emb, params["emb_ln_g"], params["emb_ln_b"])    # bf16 (B*S,H)

    # additive mask, one row per batch element (no per-head replication)
    add_mask = ((1.0 - attention_mask.astype(jnp.float32)) * -10000.0)[:, None, :]

    for layer in params["layers"]:
        # fused QKV projection (single (H,3H) matmul, bias in epilogue)
        qkv = fused_matmul_bias(h, layer["w_qkv"], layer["b_qkv"])        # (B*S,3H)
        ctx = attention(qkv.reshape(B, S, 3 * H), add_mask,
                        num_heads=num_heads).reshape(B * S, H)            # (B*S,H)
        # out-proj + bias + residual + LayerNorm fused
        h = fused_matmul_residual_ln(ctx, layer["wo"], layer["bo"], h,
                                     layer["ln1_g"], layer["ln1_b"])
        # FFN up-proj + bias + GELU fused
        inter = fused_matmul_bias(h, layer["wi"], layer["bi"], activation="gelu")
        # FFN down-proj + bias + residual + LayerNorm fused
        h = fused_matmul_residual_ln(inter, layer["wf"], layer["bf"], h,
                                     layer["ln2_g"], layer["ln2_b"])

    cls = h.reshape(B, S, H)[:, 0, :]                                     # (B,H)
    return classifier_head(cls, params["fc_w"], params["fc_b"],
                           num_labels=num_labels,
                           apply_softmax=(mode != "train"))


# --------------------------------- main --------------------------------------

if __name__ == "__main__":
    key = jax.random.PRNGKey(0)
    kp, ki, kt = jax.random.split(key, 3)

    B, S = 2, 8
    params, num_heads = init_params(kp)

    input_ids = jax.random.randint(ki, (B, S), 0, 100, dtype=jnp.int32)
    token_type_ids = jax.random.randint(kt, (B, S), 0, 2, dtype=jnp.int32)
    attention_mask = jnp.ones((B, S), jnp.int32).at[1, 6:].set(0)  # pad last 2 of row 1

    logits = bert_classification(params, input_ids, attention_mask,
                                 token_type_ids, num_heads=num_heads, mode="train")
    probs = bert_classification(params, input_ids, attention_mask,
                                token_type_ids, num_heads=num_heads, mode="eval")
    jax.block_until_ready((logits, probs))

    assert logits.shape == (B, 3) and probs.shape == (B, 3)
    assert bool(jnp.all(jnp.abs(jnp.sum(probs, axis=1) - 1.0) < 1e-5))
    print("KERNEL_OK")
</pallas_src>

<mosaic_0001>
module attributes {stable_mosaic.version = 11 : i64} {
  func.func @_ln_kernel(%arg0: i32, %arg1: memref<16x32xf32, #tpu.memory_space<vmem>>, %arg2: memref<1x32xf32, #tpu.memory_space<vmem>>, %arg3: memref<1x32xf32, #tpu.memory_space<vmem>>, %arg4: memref<16x32xbf16, #tpu.memory_space<vmem>>) attributes {dimension_semantics = [#tpu.dimension_semantics<parallel>], iteration_bounds = array<i64: 1>, scalar_prefetch = 0 : i64, scratch_operands = 0 : i64, tpu.core_type = #tpu.core_type<tc>, window_params = [{transform_indices = @transform_0, window_bounds = array<i64: 16, 32>}, {pipeline_mode = #tpu.pipeline_mode<synchronous>, transform_indices = @transform_1, window_bounds = array<i64: 1, 32>}, {pipeline_mode = #tpu.pipeline_mode<synchronous>, transform_indices = @transform_2, window_bounds = array<i64: 1, 32>}, {transform_indices = @transform_3, window_bounds = array<i64: 16, 32>}]} {
    %c0 = arith.constant 0 : index
    %c0_0 = arith.constant 0 : index
    %0 = vector.load %arg1[%c0, %c0_0] : memref<16x32xf32, #tpu.memory_space<vmem>>, vector<16x32xf32>
    %cst = arith.constant dense<0.000000e+00> : vector<16xf32>
    %1 = vector.multi_reduction <add>, %0, %cst [1] : vector<16x32xf32> to vector<16xf32>
    %2 = vector.shape_cast %1 : vector<16xf32> to vector<16x1xf32>
    %cst_1 = arith.constant 3.200000e+01 : f32
    %3 = vector.broadcast %cst_1 : f32 to vector<16x1xf32>
    %4 = arith.divf %2, %3 : vector<16x1xf32>
    %5 = vector.broadcast %4 : vector<16x1xf32> to vector<16x32xf32>
    %6 = arith.subf %0, %5 : vector<16x32xf32>
    %7 = arith.mulf %6, %6 : vector<16x32xf32>
    %cst_2 = arith.constant dense<0.000000e+00> : vector<16xf32>
    %8 = vector.multi_reduction <add>, %7, %cst_2 [1] : vector<16x32xf32> to vector<16xf32>
    %9 = vector.shape_cast %8 : vector<16xf32> to vector<16x1xf32>
    %cst_3 = arith.constant 3.200000e+01 : f32
    %10 = vector.broadcast %cst_3 : f32 to vector<16x1xf32>
    %11 = arith.divf %9, %10 : vector<16x1xf32>
    %cst_4 = arith.constant 9.99999996E-13 : f32
    %12 = vector.broadcast %cst_4 : f32 to vector<16x1xf32>
    %13 = arith.addf %11, %12 : vector<16x1xf32>
    %14 = math.rsqrt %13 : vector<16x1xf32>
    %15 = vector.broadcast %4 : vector<16x1xf32> to vector<16x32xf32>
    %16 = arith.subf %0, %15 : vector<16x32xf32>
    %17 = vector.broadcast %14 : vector<16x1xf32> to vector<16x32xf32>
    %18 = arith.mulf %16, %17 : vector<16x32xf32>
    %c0_5 = arith.constant 0 : index
    %c0_6 = arith.constant 0 : index
    %19 = vector.load %arg2[%c0_5, %c0_6] : memref<1x32xf32, #tpu.memory_space<vmem>>, vector<1x32xf32>
    %20 = vector.broadcast %19 : vector<1x32xf32> to vector<16x32xf32>
    %21 = arith.mulf %18, %20 : vector<16x32xf32>
    %c0_7 = arith.constant 0 : index
    %c0_8 = arith.constant 0 : index
    %22 = vector.load %arg3[%c0_7, %c0_8] : memref<1x32xf32, #tpu.memory_space<vmem>>, vector<1x32xf32>
    %23 = vector.broadcast %22 : vector<1x32xf32> to vector<16x32xf32>
    %24 = arith.addf %21, %23 : vector<16x32xf32>
    %25 = arith.truncf %24 : vector<16x32xf32> to vector<16x32xbf16>
    %c0_9 = arith.constant 0 : index
    %c0_10 = arith.constant 0 : index
    %26 = vector.load %arg4[%c0_9, %c0_10] : memref<16x32xbf16, #tpu.memory_space<vmem>>, vector<16x32xbf16>
    tpu.vector_store %arg4[%c0_9, %c0_10], %25 {strides = array<i32>} : memref<16x32xbf16, #tpu.memory_space<vmem>>, vector<16x32xbf16>,
    return
  }
  func.func @transform_0(%arg0: i32) -> (i32, i32) {
    %c0_i32 = arith.constant 0 : i32
    %c0_i32_0 = arith.constant 0 : i32
    return %arg0, %c0_i32 : i32, i32
  }
  func.func @transform_1(%arg0: i32) -> (i32, i32) {
    %c0_i32 = arith.constant 0 : i32
    %c0_i32_0 = arith.constant 0 : i32
    %c0_i32_1 = arith.constant 0 : i32
    return %c0_i32, %c0_i32_0 : i32, i32
  }
  func.func @transform_2(%arg0: i32) -> (i32, i32) {
    %c0_i32 = arith.constant 0 : i32
    %c0_i32_0 = arith.constant 0 : i32
    %c0_i32_1 = arith.constant 0 : i32
    return %c0_i32, %c0_i32_0 : i32, i32
  }
  func.func @transform_3(%arg0: i32) -> (i32, i32) {
    %c0_i32 = arith.constant 0 : i32
    %c0_i32_0 = arith.constant 0 : i32
    return %arg0, %c0_i32 : i32, i32
  }
}

module attributes {stable_mosaic.version = 11 : i64} {
  func.func @_mm_bias_kernel(%arg0: i32, %arg1: i32, %arg2: i32, %arg3: memref<16x32xbf16, #tpu.memory_space<vmem>>, %arg4: memref<32x96xbf16, #tpu.memory_space<vmem>>, %arg5: memref<1x96xf32, #tpu.memory_space<vmem>>, %arg6: memref<16x96xbf16, #tpu.memory_space<vmem>>, %arg7: memref<16x96xf32, #tpu.memory_space<vmem>>) attributes {dimension_semantics = [#tpu.dimension_semantics<parallel>, #tpu.dimension_semantics<parallel>, #tpu.dimension_semantics<arbitrary>], iteration_bounds = array<i64: 1, 1, 1>, scalar_prefetch = 0 : i64, scratch_operands = 1 : i64, tpu.core_type = #tpu.core_type<tc>, window_params = [{transform_indices = @transform_0, window_bounds = array<i64: 16, 32>}, {transform_indices = @transform_1, window_bounds = array<i64: 32, 96>}, {transform_indices = @transform_2, window_bounds = array<i64: 1, 96>}, {transform_indices = @transform_3, window_bounds = array<i64: 16, 96>}]} {
    %c0_i32 = arith.constant 0 : i32
    %0 = arith.cmpi eq, %arg2, %c0_i32 : i32
    %1 = arith.extui %0 : i1 to i32
    %c0_i32_0 = arith.constant 0 : i32
    %2 = arith.cmpi ne, %1, %c0_i32_0 : i32
    scf.if %2 {
      %cst_10 = arith.constant 0.000000e+00 : f32
      %12 = vector.broadcast %cst_10 : f32 to vector<16x96xf32>
      %c0_11 = arith.constant 0 : index
      %c0_12 = arith.constant 0 : index
      %13 = vector.load %arg7[%c0_11, %c0_12] : memref<16x96xf32, #tpu.memory_space<vmem>>, vector<16x96xf32>
      tpu.vector_store %arg7[%c0_11, %c0_12], %12 {strides = array<i32>} : memref<16x96xf32, #tpu.memory_space<vmem>>, vector<16x96xf32>,
    } else {
    }
    %c0 = arith.constant 0 : index
    %c0_1 = arith.constant 0 : index
    %3 = vector.load %arg7[%c0, %c0_1] : memref<16x96xf32, #tpu.memory_space<vmem>>, vector<16x96xf32>
    %c0_2 = arith.constant 0 : index
    %c0_3 = arith.constant 0 : index
    %4 = vector.load %arg3[%c0_2, %c0_3] : memref<16x32xbf16, #tpu.memory_space<vmem>>, vector<16x32xbf16>
    %c0_4 = arith.constant 0 : index
    %c0_5 = arith.constant 0 : index
    %5 = vector.load %arg4[%c0_4, %c0_5] : memref<32x96xbf16, #tpu.memory_space<vmem>>, vector<32x96xbf16>
    %cst = arith.constant dense<0.000000e+00> : vector<16x96xf32>
    %6 = tpu.matmul %4, %5, %cst {dimension_numbers = #tpu.dot_dimension_numbers<[1], [0], [0], [1], [0, 0, 1, 1], [], []>} : vector<16x32xbf16>, vector<32x96xbf16>, vector<16x96xf32> -> vector<16x96xf32>
    %7 = arith.addf %3, %6 : vector<16x96xf32>
    %c0_6 = arith.constant 0 : index
    %c0_7 = arith.constant 0 : index
    %8 = vector.load %arg7[%c0_6, %c0_7] : memref<16x96xf32, #tpu.memory_space<vmem>>, vector<16x96xf32>
    tpu.vector_store %arg7[%c0_6, %c0_7], %7 {strides = array<i32>} : memref<16x96xf32, #tpu.memory_space<vmem>>, vector<16x96xf32>,
    %c0_i32_8 = arith.constant 0 : i32
    %9 = arith.cmpi eq, %arg2, %c0_i32_8 : i32
    %10 = arith.extui %9 : i1 to i32
    %c0_i32_9 = arith.constant 0 : i32
    %11 = arith.cmpi ne, %10, %c0_i32_9 : i32
    scf.if %11 {
      %c0_10 = arith.constant 0 : index
      %c0_11 = arith.constant 0 : index
      %12 = vector.load %arg7[%c0_10, %c0_11] : memref<16x96xf32, #tpu.memory_space<vmem>>, vector<16x96xf32>
      %c0_12 = arith.constant 0 : index
      %c0_13 = arith.constant 0 : index
      %13 = vector.load %arg5[%c0_12, %c0_13] : memref<1x96xf32, #tpu.memory_space<vmem>>, vector<1x96xf32>
      %14 = vector.broadcast %13 : vector<1x96xf32> to vector<16x96xf32>
      %15 = arith.addf %12, %14 : vector<16x96xf32>
      %16 = arith.truncf %15 : vector<16x96xf32> to vector<16x96xbf16>
      %c0_14 = arith.constant 0 : index
      %c0_15 = arith.constant 0 : index
      %17 = vector.load %arg6[%c0_14, %c0_15] : memref<16x96xbf16, #tpu.memory_space<vmem>>, vector<16x96xbf16>
      tpu.vector_store %arg6[%c0_14, %c0_15], %16 {strides = array<i32>} : memref<16x96xbf16, #tpu.memory_space<vmem>>, vector<16x96xbf16>,
    } else {
    }
    return
  }
  func.func @transform_0(%arg0: i32, %arg1: i32, %arg2: i32) -> (i32, i32) {
    %c0_i32 = arith.constant 0 : i32
    return %arg0, %arg2 : i32, i32
  }
  func.func @transform_1(%arg0: i32, %arg1: i32, %arg2: i32) -> (i32, i32) {
    %c0_i32 = arith.constant 0 : i32
    return %arg2, %arg1 : i32, i32
  }
  func.func @transform_2(%arg0: i32, %arg1: i32, %arg2: i32) -> (i32, i32) {
    %c0_i32 = arith.constant 0 : i32
    %c0_i32_0 = arith.constant 0 : i32
    return %c0_i32, %arg1 : i32, i32
  }
  func.func @transform_3(%arg0: i32, %arg1: i32, %arg2: i32) -> (i32, i32) {
    %c0_i32 = arith.constant 0 : i32
    return %arg0, %arg1 : i32, i32
  }
}

module attributes {stable_mosaic.version = 11 : i64} {
  func.func @_attn_kernel(%arg0: i32, %arg1: memref<1x8x96xbf16, #tpu.memory_space<vmem>>, %arg2: memref<1x1x8xf32, #tpu.memory_space<vmem>>, %arg3: memref<1x8x32xbf16, #tpu.memory_space<vmem>>) attributes {dimension_semantics = [#tpu.dimension_semantics<parallel>], iteration_bounds = array<i64: 2>, scalar_prefetch = 0 : i64, scratch_operands = 0 : i64, tpu.core_type = #tpu.core_type<tc>, window_params = [{transform_indices = @transform_0, window_bounds = array<i64: 1, 8, 96>}, {transform_indices = @transform_1, window_bounds = array<i64: 1, 1, 8>}, {transform_indices = @transform_2, window_bounds = array<i64: 1, 8, 32>}]} {
    %c0 = arith.constant 0 : index
    %c0_0 = arith.constant 0 : index
    %c0_1 = arith.constant 0 : index
    %0 = vector.load %arg1[%c0, %c0_0, %c0_1] : memref<1x8x96xbf16, #tpu.memory_space<vmem>>, vector<1x8x96xbf16>
    %1 = vector.shape_cast %0 : vector<1x8x96xbf16> to vector<8x96xbf16>
    %c0_2 = arith.constant 0 : index
    %c0_3 = arith.constant 0 : index
    %c0_4 = arith.constant 0 : index
    %2 = vector.load %arg2[%c0_2, %c0_3, %c0_4] : memref<1x1x8xf32, #tpu.memory_space<vmem>>, vector<1x1x8xf32>
    %3 = vector.shape_cast %2 : vector<1x1x8xf32> to vector<1x8xf32>
    %4 = vector.extract_strided_slice %1 {offsets = [0, 0], sizes = [8, 8], strides = [1, 1]} : vector<8x96xbf16> to vector<8x8xbf16>
    %5 = vector.extract_strided_slice %1 {offsets = [0, 32], sizes = [8, 8], strides = [1, 1]} : vector<8x96xbf16> to vector<8x8xbf16>
    %6 = vector.extract_strided_slice %1 {offsets = [0, 64], sizes = [8, 8], strides = [1, 1]} : vector<8x96xbf16> to vector<8x8xbf16>
    %cst = arith.constant dense<0.000000e+00> : vector<8x8xf32>
    %7 = tpu.matmul %4, %5, %cst {dimension_numbers = #tpu.dot_dimension_numbers<[1], [1], [0], [0], [0, 0, 1, 0], [], []>} : vector<8x8xbf16>, vector<8x8xbf16>, vector<8x8xf32> -> vector<8x8xf32>
    %cst_5 = arith.constant 0.353553385 : f32
    %8 = vector.broadcast %cst_5 : f32 to vector<8x8xf32>
    %9 = arith.mulf %7, %8 : vector<8x8xf32>
    %10 = vector.broadcast %3 : vector<1x8xf32> to vector<8x8xf32>
    %11 = arith.addf %9, %10 : vector<8x8xf32>
    %cst_6 = arith.constant dense<0xFF800000> : vector<8xf32>
    %12 = vector.multi_reduction <maximumf>, %11, %cst_6 [1] : vector<8x8xf32> to vector<8xf32>
    %13 = vector.shape_cast %12 : vector<8xf32> to vector<8x1xf32>
    %14 = vector.broadcast %13 : vector<8x1xf32> to vector<8x8xf32>
    %15 = arith.subf %11, %14 : vector<8x8xf32>
    %16 = math.exp %15 : vector<8x8xf32>
    %cst_7 = arith.constant dense<0.000000e+00> : vector<8xf32>
    %17 = vector.multi_reduction <add>, %16, %cst_7 [1] : vector<8x8xf32> to vector<8xf32>
    %18 = vector.shape_cast %17 : vector<8xf32> to vector<8x1xf32>
    %19 = tpu.reciprocal %18 {approx = true} : vector<8x1xf32> -> vector<8x1xf32>
    %20 = vector.broadcast %19 : vector<8x1xf32> to vector<8x8xf32>
    %21 = arith.mulf %16, %20 : vector<8x8xf32>
    %22 = arith.truncf %21 : vector<8x8xf32> to vector<8x8xbf16>
    %cst_8 = arith.constant dense<0.000000e+00> : vector<8x8xf32>
    %23 = tpu.matmul %22, %6, %cst_8 {dimension_numbers = #tpu.dot_dimension_numbers<[1], [0], [0], [1], [0, 0, 1, 1], [], []>} : vector<8x8xbf16>, vector<8x8xbf16>, vector<8x8xf32> -> vector<8x8xf32>
    %24 = vector.extract_strided_slice %1 {offsets = [0, 8], sizes = [8, 8], strides = [1, 1]} : vector<8x96xbf16> to vector<8x8xbf16>
    %25 = vector.extract_strided_slice %1 {offsets = [0, 40], sizes = [8, 8], strides = [1, 1]} : vector<8x96xbf16> to vector<8x8xbf16>
    %26 = vector.extract_strided_slice %1 {offsets = [0, 72], sizes = [8, 8], strides = [1, 1]} : vector<8x96xbf16> to vector<8x8xbf16>
    %cst_9 = arith.constant dense<0.000000e+00> : vector<8x8xf32>
    %27 = tpu.matmul %24, %25, %cst_9 {dimension_numbers = #tpu.dot_dimension_numbers<[1], [1], [0], [0], [0, 0, 1, 0], [], []>} : vector<8x8xbf16>, vector<8x8xbf16>, vector<8x8xf32> -> vector<8x8xf32>
    %cst_10 = arith.constant 0.353553385 : f32
    %28 = vector.broadcast %cst_10 : f32 to vector<8x8xf32>
    %29 = arith.mulf %27, %28 : vector<8x8xf32>
    %30 = vector.broadcast %3 : vector<1x8xf32> to vector<8x8xf32>
    %31 = arith.addf %29, %30 : vector<8x8xf32>
    %cst_11 = arith.constant dense<0xFF800000> : vector<8xf32>
    %32 = vector.multi_reduction <maximumf>, %31, %cst_11 [1] : vector<8x8xf32> to vector<8xf32>
    %33 = vector.shape_cast %32 : vector<8xf32> to vector<8x1xf32>
    %34 = vector.broadcast %33 : vector<8x1xf32> to vector<8x8xf32>
    %35 = arith.subf %31, %34 : vector<8x8xf32>
    %36 = math.exp %35 : vector<8x8xf32>
    %cst_12 = arith.constant dense<0.000000e+00> : vector<8xf32>
    %37 = vector.multi_reduction <add>, %36, %cst_12 [1] : vector<8x8xf32> to vector<8xf32>
    %38 = vector.shape_cast %37 : vector<8xf32> to vector<8x1xf32>
    %39 = tpu.reciprocal %38 {approx = true} : vector<8x1xf32> -> vector<8x1xf32>
    %40 = vector.broadcast %39 : vector<8x1xf32> to vector<8x8xf32>
    %41 = arith.mulf %36, %40 : vector<8x8xf32>
    %42 = arith.truncf %41 : vector<8x8xf32> to vector<8x8xbf16>
    %cst_13 = arith.constant dense<0.000000e+00> : vector<8x8xf32>
    %43 = tpu.matmul %42, %26, %cst_13 {dimension_numbers = #tpu.dot_dimension_numbers<[1], [0], [0], [1], [0, 0, 1, 1], [], []>} : vector<8x8xbf16>, vector<8x8xbf16>, vector<8x8xf32> -> vector<8x8xf32>
    %44 = vector.extract_strided_slice %1 {offsets = [0, 16], sizes = [8, 8], strides = [1, 1]} : vector<8x96xbf16> to vector<8x8xbf16>
    %45 = vector.extract_strided_slice %1 {offsets = [0, 48], sizes = [8, 8], strides = [1, 1]} : vector<8x96xbf16> to vector<8x8xbf16>
    %46 = vector.extract_strided_slice %1 {offsets = [0, 80], sizes = [8, 8], strides = [1, 1]} : vector<8x96xbf16> to vector<8x8xbf16>
    %cst_14 = arith.constant dense<0.000000e+00> : vector<8x8xf32>
    %47 = tpu.matmul %44, %45, %cst_14 {dimension_numbers = #tpu.dot_dimension_numbers<[1], [1], [0], [0], [0, 0, 1, 0], [], []>} : vector<8x8xbf16>, vector<8x8xbf16>, vector<8x8xf32> -> vector<8x8xf32>
    %cst_15 = arith.constant 0.353553385 : f32
    %48 = vector.broadcast %cst_15 : f32 to vector<8x8xf32>
    %49 = arith.mulf %47, %48 : vector<8x8xf32>
    %50 = vector.broadcast %3 : vector<1x8xf32> to vector<8x8xf32>
    %51 = arith.addf %49, %50 : vector<8x8xf32>
    %cst_16 = arith.constant dense<0xFF800000> : vector<8xf32>
    %52 = vector.multi_reduction <maximumf>, %51, %cst_16 [1] : vector<8x8xf32> to vector<8xf32>
    %53 = vector.shape_cast %52 : vector<8xf32> to vector<8x1xf32>
    %54 = vector.broadcast %53 : vector<8x1xf32> to vector<8x8xf32>
    %55 = arith.subf %51, %54 : vector<8x8xf32>
    %56 = math.exp %55 : vector<8x8xf32>
    %cst_17 = arith.constant dense<0.000000e+00> : vector<8xf32>
    %57 = vector.multi_reduction <add>, %56, %cst_17 [1] : vector<8x8xf32> to vector<8xf32>
    %58 = vector.shape_cast %57 : vector<8xf32> to vector<8x1xf32>
    %59 = tpu.reciprocal %58 {approx = true} : vector<8x1xf32> -> vector<8x1xf32>
    %60 = vector.broadcast %59 : vector<8x1xf32> to vector<8x8xf32>
    %61 = arith.mulf %56, %60 : vector<8x8xf32>
    %62 = arith.truncf %61 : vector<8x8xf32> to vector<8x8xbf16>
    %cst_18 = arith.constant dense<0.000000e+00> : vector<8x8xf32>
    %63 = tpu.matmul %62, %46, %cst_18 {dimension_numbers = #tpu.dot_dimension_numbers<[1], [0], [0], [1], [0, 0, 1, 1], [], []>} : vector<8x8xbf16>, vector<8x8xbf16>, vector<8x8xf32> -> vector<8x8xf32>
    %64 = vector.extract_strided_slice %1 {offsets = [0, 24], sizes = [8, 8], strides = [1, 1]} : vector<8x96xbf16> to vector<8x8xbf16>
    %65 = vector.extract_strided_slice %1 {offsets = [0, 56], sizes = [8, 8], strides = [1, 1]} : vector<8x96xbf16> to vector<8x8xbf16>
    %66 = vector.extract_strided_slice %1 {offsets = [0, 88], sizes = [8, 8], strides = [1, 1]} : vector<8x96xbf16> to vector<8x8xbf16>
    %cst_19 = arith.constant dense<0.000000e+00> : vector<8x8xf32>
    %67 = tpu.matmul %64, %65, %cst_19 {dimension_numbers = #tpu.dot_dimension_numbers<[1], [1], [0], [0], [0, 0, 1, 0], [], []>} : vector<8x8xbf16>, vector<8x8xbf16>, vector<8x8xf32> -> vector<8x8xf32>
    %cst_20 = arith.constant 0.353553385 : f32
    %68 = vector.broadcast %cst_20 : f32 to vector<8x8xf32>
    %69 = arith.mulf %67, %68 : vector<8x8xf32>
    %70 = vector.broadcast %3 : vector<1x8xf32> to vector<8x8xf32>
    %71 = arith.addf %69, %70 : vector<8x8xf32>
    %cst_21 = arith.constant dense<0xFF800000> : vector<8xf32>
    %72 = vector.multi_reduction <maximumf>, %71, %cst_21 [1] : vector<8x8xf32> to vector<8xf32>
    %73 = vector.shape_cast %72 : vector<8xf32> to vector<8x1xf32>
    %74 = vector.broadcast %73 : vector<8x1xf32> to vector<8x8xf32>
    %75 = arith.subf %71, %74 : vector<8x8xf32>
    %76 = math.exp %75 : vector<8x8xf32>
    %cst_22 = arith.constant dense<0.000000e+00> : vector<8xf32>
    %77 = vector.multi_reduction <add>, %76, %cst_22 [1] : vector<8x8xf32> to vector<8xf32>
    %78 = vector.shape_cast %77 : vector<8xf32> to vector<8x1xf32>
    %79 = tpu.reciprocal %78 {approx = true} : vector<8x1xf32> -> vector<8x1xf32>
    %80 = vector.broadcast %79 : vector<8x1xf32> to vector<8x8xf32>
    %81 = arith.mulf %76, %80 : vector<8x8xf32>
    %82 = arith.truncf %81 : vector<8x8xf32> to vector<8x8xbf16>
    %cst_23 = arith.constant dense<0.000000e+00> : vector<8x8xf32>
    %83 = tpu.matmul %82, %66, %cst_23 {dimension_numbers = #tpu.dot_dimension_numbers<[1], [0], [0], [1], [0, 0, 1, 1], [], []>} : vector<8x8xbf16>, vector<8x8xbf16>, vector<8x8xf32> -> vector<8x8xf32>
    %84 = tpu.concatenate %23, %43, %63, %83 in 1 : vector<8x8xf32>, vector<8x8xf32>, vector<8x8xf32>, vector<8x8xf32> -> vector<8x32xf32>
    %85 = arith.truncf %84 : vector<8x32xf32> to vector<8x32xbf16>
    %c0_24 = arith.constant 0 : index
    %c0_25 = arith.constant 0 : index
    %c0_26 = arith.constant 0 : index
    %86 = vector.load %arg3[%c0_24, %c0_25, %c0_26] : memref<1x8x32xbf16, #tpu.memory_space<vmem>>, vector<1x8x32xbf16>
    %87 = vector.shape_cast %86 : vector<1x8x32xbf16> to vector<8x32xbf16>
    %88 = vector.shape_cast %85 : vector<8x32xbf16> to vector<1x8x32xbf16>
    tpu.vector_store %arg3[%c0_24, %c0_25, %c0_26], %88 {strides = array<i32>} : memref<1x8x32xbf16, #tpu.memory_space<vmem>>, vector<1x8x32xbf16>,
    return
  }
  func.func @transform_0(%arg0: i32) -> (i32, i32, i32) {
    %c0_i32 = arith.constant 0 : i32
    %c0_i32_0 = arith.constant 0 : i32
    %c0_i32_1 = arith.constant 0 : i32
    return %arg0, %c0_i32, %c0_i32_0 : i32, i32, i32
  }
  func.func @transform_1(%arg0: i32) -> (i32, i32, i32) {
    %c0_i32 = arith.constant 0 : i32
    %c0_i32_0 = arith.constant 0 : i32
    %c0_i32_1 = arith.constant 0 : i32
    return %arg0, %c0_i32, %c0_i32_0 : i32, i32, i32
  }
  func.func @transform_2(%arg0: i32) -> (i32, i32, i32) {
    %c0_i32 = arith.constant 0 : i32
    %c0_i32_0 = arith.constant 0 : i32
    %c0_i32_1 = arith.constant 0 : i32
    return %arg0, %c0_i32, %c0_i32_0 : i32, i32, i32
  }
}

module attributes {stable_mosaic.version = 11 : i64} {
  func.func @_mm_res_ln_kernel(%arg0: i32, %arg1: i32, %arg2: memref<16x32xbf16, #tpu.memory_space<vmem>>, %arg3: memref<32x32xbf16, #tpu.memory_space<vmem>>, %arg4: memref<1x32xf32, #tpu.memory_space<vmem>>, %arg5: memref<16x32xbf16, #tpu.memory_space<vmem>>, %arg6: memref<1x32xf32, #tpu.memory_space<vmem>>, %arg7: memref<1x32xf32, #tpu.memory_space<vmem>>, %arg8: memref<16x32xbf16, #tpu.memory_space<vmem>>, %arg9: memref<16x32xf32, #tpu.memory_space<vmem>>) attributes {dimension_semantics = [#tpu.dimension_semantics<parallel>, #tpu.dimension_semantics<arbitrary>], iteration_bounds = array<i64: 1, 1>, scalar_prefetch = 0 : i64, scratch_operands = 1 : i64, tpu.core_type = #tpu.core_type<tc>, window_params = [{transform_indices = @transform_0, window_bounds = array<i64: 16, 32>}, {transform_indices = @transform_1, window_bounds = array<i64: 32, 32>}, {pipeline_mode = #tpu.pipeline_mode<synchronous>, transform_indices = @transform_2, window_bounds = array<i64: 1, 32>}, {transform_indices = @transform_3, window_bounds = array<i64: 16, 32>}, {pipeline_mode = #tpu.pipeline_mode<synchronous>, transform_indices = @transform_4, window_bounds = array<i64: 1, 32>}, {pipeline_mode = #tpu.pipeline_mode<synchronous>, transform_indices = @transform_5, window_bounds = array<i64: 1, 32>}, {transform_indices = @transform_6, window_bounds = array<i64: 16, 32>}]} {
    %c0_i32 = arith.constant 0 : i32
    %0 = arith.cmpi eq, %arg1, %c0_i32 : i32
    %1 = arith.extui %0 : i1 to i32
    %c0_i32_0 = arith.constant 0 : i32
    %2 = arith.cmpi ne, %1, %c0_i32_0 : i32
    scf.if %2 {
      %cst_10 = arith.constant 0.000000e+00 : f32
      %12 = vector.broadcast %cst_10 : f32 to vector<16x32xf32>
      %c0_11 = arith.constant 0 : index
      %c0_12 = arith.constant 0 : index
      %13 = vector.load %arg9[%c0_11, %c0_12] : memref<16x32xf32, #tpu.memory_space<vmem>>, vector<16x32xf32>
      tpu.vector_store %arg9[%c0_11, %c0_12], %12 {strides = array<i32>} : memref<16x32xf32, #tpu.memory_space<vmem>>, vector<16x32xf32>,
    } else {
    }
    %c0 = arith.constant 0 : index
    %c0_1 = arith.constant 0 : index
    %3 = vector.load %arg9[%c0, %c0_1] : memref<16x32xf32, #tpu.memory_space<vmem>>, vector<16x32xf32>
    %c0_2 = arith.constant 0 : index
    %c0_3 = arith.constant 0 : index
    %4 = vector.load %arg2[%c0_2, %c0_3] : memref<16x32xbf16, #tpu.memory_space<vmem>>, vector<16x32xbf16>
    %c0_4 = arith.constant 0 : index
    %c0_5 = arith.constant 0 : index
    %5 = vector.load %arg3[%c0_4, %c0_5] : memref<32x32xbf16, #tpu.memory_space<vmem>>, vector<32x32xbf16>
    %cst = arith.constant dense<0.000000e+00> : vector<16x32xf32>
    %6 = tpu.matmul %4, %5, %cst {dimension_numbers = #tpu.dot_dimension_numbers<[1], [0], [0], [1], [0, 0, 1, 1], [], []>} : vector<16x32xbf16>, vector<32x32xbf16>, vector<16x32xf32> -> vector<16x32xf32>
    %7 = arith.addf %3, %6 : vector<16x32xf32>
    %c0_6 = arith.constant 0 : index
    %c0_7 = arith.constant 0 : index
    %8 = vector.load %arg9[%c0_6, %c0_7] : memref<16x32xf32, #tpu.memory_space<vmem>>, vector<16x32xf32>
    tpu.vector_store %arg9[%c0_6, %c0_7], %7 {strides = array<i32>} : memref<16x32xf32, #tpu.memory_space<vmem>>, vector<16x32xf32>,
    %c0_i32_8 = arith.constant 0 : i32
    %9 = arith.cmpi eq, %arg1, %c0_i32_8 : i32
    %10 = arith.extui %9 : i1 to i32
    %c0_i32_9 = arith.constant 0 : i32
    %11 = arith.cmpi ne, %10, %c0_i32_9 : i32
    scf.if %11 {
      %c0_10 = arith.constant 0 : index
      %c0_11 = arith.constant 0 : index
      %12 = vector.load %arg9[%c0_10, %c0_11] : memref<16x32xf32, #tpu.memory_space<vmem>>, vector<16x32xf32>
      %c0_12 = arith.constant 0 : index
      %c0_13 = arith.constant 0 : index
      %13 = vector.load %arg4[%c0_12, %c0_13] : memref<1x32xf32, #tpu.memory_space<vmem>>, vector<1x32xf32>
      %14 = vector.broadcast %13 : vector<1x32xf32> to vector<16x32xf32>
      %15 = arith.addf %12, %14 : vector<16x32xf32>
      %c0_14 = arith.constant 0 : index
      %c0_15 = arith.constant 0 : index
      %16 = vector.load %arg5[%c0_14, %c0_15] : memref<16x32xbf16, #tpu.memory_space<vmem>>, vector<16x32xbf16>
      %17 = arith.extf %16 : vector<16x32xbf16> to vector<16x32xf32>
      %18 = arith.addf %15, %17 : vector<16x32xf32>
      %cst_16 = arith.constant dense<0.000000e+00> : vector<16xf32>
      %19 = vector.multi_reduction <add>, %18, %cst_16 [1] : vector<16x32xf32> to vector<16xf32>
      %20 = vector.shape_cast %19 : vector<16xf32> to vector<16x1xf32>
      %cst_17 = arith.constant 3.200000e+01 : f32
      %21 = vector.broadcast %cst_17 : f32 to vector<16x1xf32>
      %22 = arith.divf %20, %21 : vector<16x1xf32>
      %23 = vector.broadcast %22 : vector<16x1xf32> to vector<16x32xf32>
      %24 = arith.subf %18, %23 : vector<16x32xf32>
      %25 = arith.mulf %24, %24 : vector<16x32xf32>
      %cst_18 = arith.constant dense<0.000000e+00> : vector<16xf32>
      %26 = vector.multi_reduction <add>, %25, %cst_18 [1] : vector<16x32xf32> to vector<16xf32>
      %27 = vector.shape_cast %26 : vector<16xf32> to vector<16x1xf32>
      %cst_19 = arith.constant 3.200000e+01 : f32
      %28 = vector.broadcast %cst_19 : f32 to vector<16x1xf32>
      %29 = arith.divf %27, %28 : vector<16x1xf32>
      %cst_20 = arith.constant 9.99999996E-13 : f32
      %30 = vector.broadcast %cst_20 : f32 to vector<16x1xf32>
      %31 = arith.addf %29, %30 : vector<16x1xf32>
      %32 = math.rsqrt %31 : vector<16x1xf32>
      %33 = vector.broadcast %22 : vector<16x1xf32> to vector<16x32xf32>
      %34 = arith.subf %18, %33 : vector<16x32xf32>
      %35 = vector.broadcast %32 : vector<16x1xf32> to vector<16x32xf32>
      %36 = arith.mulf %34, %35 : vector<16x32xf32>
      %c0_21 = arith.constant 0 : index
      %c0_22 = arith.constant 0 : index
      %37 = vector.load %arg6[%c0_21, %c0_22] : memref<1x32xf32, #tpu.memory_space<vmem>>, vector<1x32xf32>
      %38 = vector.broadcast %37 : vector<1x32xf32> to vector<16x32xf32>
      %39 = arith.mulf %36, %38 : vector<16x32xf32>
      %c0_23 = arith.constant 0 : index
      %c0_24 = arith.constant 0 : index
      %40 = vector.load %arg7[%c0_23, %c0_24] : memref<1x32xf32, #tpu.memory_space<vmem>>, vector<1x32xf32>
      %41 = vector.broadcast %40 : vector<1x32xf32> to vector<16x32xf32>
      %42 = arith.addf %39, %41 : vector<16x32xf32>
      %43 = arith.truncf %42 : vector<16x32xf32> to vector<16x32xbf16>
      %c0_25 = arith.constant 0 : index
      %c0_26 = arith.constant 0 : index
      %44 = vector.load %arg8[%c0_25, %c0_26] : memref<16x32xbf16, #tpu.memory_space<vmem>>, vector<16x32xbf16>
      tpu.vector_store %arg8[%c0_25, %c0_26], %43 {strides = array<i32>} : memref<16x32xbf16, #tpu.memory_space<vmem>>, vector<16x32xbf16>,
    } else {
    }
    return
  }
  func.func @transform_0(%arg0: i32, %arg1: i32) -> (i32, i32) {
    %c0_i32 = arith.constant 0 : i32
    return %arg0, %arg1 : i32, i32
  }
  func.func @transform_1(%arg0: i32, %arg1: i32) -> (i32, i32) {
    %c0_i32 = arith.constant 0 : i32
    %c0_i32_0 = arith.constant 0 : i32
    return %arg1, %c0_i32 : i32, i32
  }
  func.func @transform_2(%arg0: i32, %arg1: i32) -> (i32, i32) {
    %c0_i32 = arith.constant 0 : i32
    %c0_i32_0 = arith.constant 0 : i32
    %c0_i32_1 = arith.constant 0 : i32
    return %c0_i32, %c0_i32_0 : i32, i32
  }
  func.func @transform_3(%arg0: i32, %arg1: i32) -> (i32, i32) {
    %c0_i32 = arith.constant 0 : i32
    %c0_i32_0 = arith.constant 0 : i32
    return %arg0, %c0_i32 : i32, i32
  }
  func.func @transform_4(%arg0: i32, %arg1: i32) -> (i32, i32) {
    %c0_i32 = arith.constant 0 : i32
    %c0_i32_0 = arith.constant 0 : i32
    %c0_i32_1 = arith.constant 0 : i32
    return %c0_i32, %c0_i32_0 : i32, i32
  }
  func.func @transform_5(%arg0: i32, %arg1: i32) -> (i32, i32) {
    %c0_i32 = arith.constant 0 : i32
    %c0_i32_0 = arith.constant 0 : i32
    %c0_i32_1 = arith.constant 0 : i32
    return %c0_i32, %c0_i32_0 : i32, i32
  }
  func.func @transform_6(%arg0: i32, %arg1: i32) -> (i32, i32) {
    %c0_i32 = arith.constant 0 : i32
    %c0_i32_0 = arith.constant 0 : i32
    return %arg0, %c0_i32 : i32, i32
  }
}

module attributes {stable_mosaic.version = 11 : i64} {
  func.func @_mm_bias_kernel(%arg0: i32, %arg1: i32, %arg2: i32, %arg3: memref<16x32xbf16, #tpu.memory_space<vmem>>, %arg4: memref<32x64xbf16, #tpu.memory_space<vmem>>, %arg5: memref<1x64xf32, #tpu.memory_space<vmem>>, %arg6: memref<16x64xbf16, #tpu.memory_space<vmem>>, %arg7: memref<16x64xf32, #tpu.memory_space<vmem>>) attributes {dimension_semantics = [#tpu.dimension_semantics<parallel>, #tpu.dimension_semantics<parallel>, #tpu.dimension_semantics<arbitrary>], iteration_bounds = array<i64: 1, 1, 1>, scalar_prefetch = 0 : i64, scratch_operands = 1 : i64, tpu.core_type = #tpu.core_type<tc>, window_params = [{transform_indices = @transform_0, window_bounds = array<i64: 16, 32>}, {transform_indices = @transform_1, window_bounds = array<i64: 32, 64>}, {transform_indices = @transform_2, window_bounds = array<i64: 1, 64>}, {transform_indices = @transform_3, window_bounds = array<i64: 16, 64>}]} {
    %c0_i32 = arith.constant 0 : i32
    %0 = arith.cmpi eq, %arg2, %c0_i32 : i32
    %1 = arith.extui %0 : i1 to i32
    %c0_i32_0 = arith.constant 0 : i32
    %2 = arith.cmpi ne, %1, %c0_i32_0 : i32
    scf.if %2 {
      %cst_10 = arith.constant 0.000000e+00 : f32
      %12 = vector.broadcast %cst_10 : f32 to vector<16x64xf32>
      %c0_11 = arith.constant 0 : index
      %c0_12 = arith.constant 0 : index
      %13 = vector.load %arg7[%c0_11, %c0_12] : memref<16x64xf32, #tpu.memory_space<vmem>>, vector<16x64xf32>
      tpu.vector_store %arg7[%c0_11, %c0_12], %12 {strides = array<i32>} : memref<16x64xf32, #tpu.memory_space<vmem>>, vector<16x64xf32>,
    } else {
    }
    %c0 = arith.constant 0 : index
    %c0_1 = arith.constant 0 : index
    %3 = vector.load %arg7[%c0, %c0_1] : memref<16x64xf32, #tpu.memory_space<vmem>>, vector<16x64xf32>
    %c0_2 = arith.constant 0 : index
    %c0_3 = arith.constant 0 : index
    %4 = vector.load %arg3[%c0_2, %c0_3] : memref<16x32xbf16, #tpu.memory_space<vmem>>, vector<16x32xbf16>
    %c0_4 = arith.constant 0 : index
    %c0_5 = arith.constant 0 : index
    %5 = vector.load %arg4[%c0_4, %c0_5] : memref<32x64xbf16, #tpu.memory_space<vmem>>, vector<32x64xbf16>
    %cst = arith.constant dense<0.000000e+00> : vector<16x64xf32>
    %6 = tpu.matmul %4, %5, %cst {dimension_numbers = #tpu.dot_dimension_numbers<[1], [0], [0], [1], [0, 0, 1, 1], [], []>} : vector<16x32xbf16>, vector<32x64xbf16>, vector<16x64xf32> -> vector<16x64xf32>
    %7 = arith.addf %3, %6 : vector<16x64xf32>
    %c0_6 = arith.constant 0 : index
    %c0_7 = arith.constant 0 : index
    %8 = vector.load %arg7[%c0_6, %c0_7] : memref<16x64xf32, #tpu.memory_space<vmem>>, vector<16x64xf32>
    tpu.vector_store %arg7[%c0_6, %c0_7], %7 {strides = array<i32>} : memref<16x64xf32, #tpu.memory_space<vmem>>, vector<16x64xf32>,
    %c0_i32_8 = arith.constant 0 : i32
    %9 = arith.cmpi eq, %arg2, %c0_i32_8 : i32
    %10 = arith.extui %9 : i1 to i32
    %c0_i32_9 = arith.constant 0 : i32
    %11 = arith.cmpi ne, %10, %c0_i32_9 : i32
    scf.if %11 {
      %c0_10 = arith.constant 0 : index
      %c0_11 = arith.constant 0 : index
      %12 = vector.load %arg7[%c0_10, %c0_11] : memref<16x64xf32, #tpu.memory_space<vmem>>, vector<16x64xf32>
      %c0_12 = arith.constant 0 : index
      %c0_13 = arith.constant 0 : index
      %13 = vector.load %arg5[%c0_12, %c0_13] : memref<1x64xf32, #tpu.memory_space<vmem>>, vector<1x64xf32>
      %14 = vector.broadcast %13 : vector<1x64xf32> to vector<16x64xf32>
      %15 = arith.addf %12, %14 : vector<16x64xf32>
      %cst_14 = arith.constant 5.000000e-01 : f32
      %16 = vector.broadcast %cst_14 : f32 to vector<16x64xf32>
      %17 = arith.mulf %16, %15 : vector<16x64xf32>
      %cst_15 = arith.constant 4.471500e-02 : f32
      %18 = vector.broadcast %cst_15 : f32 to vector<16x64xf32>
      %19 = arith.mulf %18, %15 : vector<16x64xf32>
      %20 = arith.mulf %19, %15 : vector<16x64xf32>
      %21 = arith.mulf %20, %15 : vector<16x64xf32>
      %22 = arith.addf %15, %21 : vector<16x64xf32>
      %cst_16 = arith.constant 0.797884583 : f32
      %23 = vector.broadcast %cst_16 : f32 to vector<16x64xf32>
      %24 = arith.mulf %23, %22 : vector<16x64xf32>
      %25 = math.tanh %24 : vector<16x64xf32>
      %cst_17 = arith.constant 1.000000e+00 : f32
      %26 = vector.broadcast %cst_17 : f32 to vector<16x64xf32>
      %27 = arith.addf %26, %25 : vector<16x64xf32>
      %28 = arith.mulf %17, %27 : vector<16x64xf32>
      %29 = arith.truncf %28 : vector<16x64xf32> to vector<16x64xbf16>
      %c0_18 = arith.constant 0 : index
      %c0_19 = arith.constant 0 : index
      %30 = vector.load %arg6[%c0_18, %c0_19] : memref<16x64xbf16, #tpu.memory_space<vmem>>, vector<16x64xbf16>
      tpu.vector_store %arg6[%c0_18, %c0_19], %29 {strides = array<i32>} : memref<16x64xbf16, #tpu.memory_space<vmem>>, vector<16x64xbf16>,
    } else {
    }
    return
  }
  func.func @transform_0(%arg0: i32, %arg1: i32, %arg2: i32) -> (i32, i32) {
    %c0_i32 = arith.constant 0 : i32
    return %arg0, %arg2 : i32, i32
  }
  func.func @transform_1(%arg0: i32, %arg1: i32, %arg2: i32) -> (i32, i32) {
    %c0_i32 = arith.constant 0 : i32
    return %arg2, %arg1 : i32, i32
  }
  func.func @transform_2(%arg0: i32, %arg1: i32, %arg2: i32) -> (i32, i32) {
    %c0_i32 = arith.constant 0 : i32
    %c0_i32_0 = arith.constant 0 : i32
    return %c0_i32, %arg1 : i32, i32
  }
  func.func @transform_3(%arg0: i32, %arg1: i32, %arg2: i32) -> (i32, i32) {
    %c0_i32 = arith.constant 0 : i32
    return %arg0, %arg1 : i32, i32
  }
}

module attributes {stable_mosaic.version = 11 : i64} {
  func.func @_mm_res_ln_kernel(%arg0: i32, %arg1: i32, %arg2: memref<16x64xbf16, #tpu.memory_space<vmem>>, %arg3: memref<64x32xbf16, #tpu.memory_space<vmem>>, %arg4: memref<1x32xf32, #tpu.memory_space<vmem>>, %arg5: memref<16x32xbf16, #tpu.memory_space<vmem>>, %arg6: memref<1x32xf32, #tpu.memory_space<vmem>>, %arg7: memref<1x32xf32, #tpu.memory_space<vmem>>, %arg8: memref<16x32xbf16, #tpu.memory_space<vmem>>, %arg9: memref<16x32xf32, #tpu.memory_space<vmem>>) attributes {dimension_semantics = [#tpu.dimension_semantics<parallel>, #tpu.dimension_semantics<arbitrary>], iteration_bounds = array<i64: 1, 1>, scalar_prefetch = 0 : i64, scratch_operands = 1 : i64, tpu.core_type = #tpu.core_type<tc>, window_params = [{transform_indices = @transform_0, window_bounds = array<i64: 16, 64>}, {transform_indices = @transform_1, window_bounds = array<i64: 64, 32>}, {pipeline_mode = #tpu.pipeline_mode<synchronous>, transform_indices = @transform_2, window_bounds = array<i64: 1, 32>}, {transform_indices = @transform_3, window_bounds = array<i64: 16, 32>}, {pipeline_mode = #tpu.pipeline_mode<synchronous>, transform_indices = @transform_4, window_bounds = array<i64: 1, 32>}, {pipeline_mode = #tpu.pipeline_mode<synchronous>, transform_indices = @transform_5, window_bounds = array<i64: 1, 32>}, {transform_indices = @transform_6, window_bounds = array<i64: 16, 32>}]} {
    %c0_i32 = arith.constant 0 : i32
    %0 = arith.cmpi eq, %arg1, %c0_i32 : i32
    %1 = arith.extui %0 : i1 to i32
    %c0_i32_0 = arith.constant 0 : i32
    %2 = arith.cmpi ne, %1, %c0_i32_0 : i32
    scf.if %2 {
      %cst_10 = arith.constant 0.000000e+00 : f32
      %12 = vector.broadcast %cst_10 : f32 to vector<16x32xf32>
      %c0_11 = arith.constant 0 : index
      %c0_12 = arith.constant 0 : index
      %13 = vector.load %arg9[%c0_11, %c0_12] : memref<16x32xf32, #tpu.memory_space<vmem>>, vector<16x32xf32>
      tpu.vector_store %arg9[%c0_11, %c0_12], %12 {strides = array<i32>} : memref<16x32xf32, #tpu.memory_space<vmem>>, vector<16x32xf32>,
    } else {
    }
    %c0 = arith.constant 0 : index
    %c0_1 = arith.constant 0 : index
    %3 = vector.load %arg9[%c0, %c0_1] : memref<16x32xf32, #tpu.memory_space<vmem>>, vector<16x32xf32>
    %c0_2 = arith.constant 0 : index
    %c0_3 = arith.constant 0 : index
    %4 = vector.load %arg2[%c0_2, %c0_3] : memref<16x64xbf16, #tpu.memory_space<vmem>>, vector<16x64xbf16>
    %c0_4 = arith.constant 0 : index
    %c0_5 = arith.constant 0 : index
    %5 = vector.load %arg3[%c0_4, %c0_5] : memref<64x32xbf16, #tpu.memory_space<vmem>>, vector<64x32xbf16>
    %cst = arith.constant dense<0.000000e+00> : vector<16x32xf32>
    %6 = tpu.matmul %4, %5, %cst {dimension_numbers = #tpu.dot_dimension_numbers<[1], [0], [0], [1], [0, 0, 1, 1], [], []>} : vector<16x64xbf16>, vector<64x32xbf16>, vector<16x32xf32> -> vector<16x32xf32>
    %7 = arith.addf %3, %6 : vector<16x32xf32>
    %c0_6 = arith.constant 0 : index
    %c0_7 = arith.constant 0 : index
    %8 = vector.load %arg9[%c0_6, %c0_7] : memref<16x32xf32, #tpu.memory_space<vmem>>, vector<16x32xf32>
    tpu.vector_store %arg9[%c0_6, %c0_7], %7 {strides = array<i32>} : memref<16x32xf32, #tpu.memory_space<vmem>>, vector<16x32xf32>,
    %c0_i32_8 = arith.constant 0 : i32
    %9 = arith.cmpi eq, %arg1, %c0_i32_8 : i32
    %10 = arith.extui %9 : i1 to i32
    %c0_i32_9 = arith.constant 0 : i32
    %11 = arith.cmpi ne, %10, %c0_i32_9 : i32
    scf.if %11 {
      %c0_10 = arith.constant 0 : index
      %c0_11 = arith.constant 0 : index
      %12 = vector.load %arg9[%c0_10, %c0_11] : memref<16x32xf32, #tpu.memory_space<vmem>>, vector<16x32xf32>
      %c0_12 = arith.constant 0 : index
      %c0_13 = arith.constant 0 : index
      %13 = vector.load %arg4[%c0_12, %c0_13] : memref<1x32xf32, #tpu.memory_space<vmem>>, vector<1x32xf32>
      %14 = vector.broadcast %13 : vector<1x32xf32> to vector<16x32xf32>
      %15 = arith.addf %12, %14 : vector<16x32xf32>
      %c0_14 = arith.constant 0 : index
      %c0_15 = arith.constant 0 : index
      %16 = vector.load %arg5[%c0_14, %c0_15] : memref<16x32xbf16, #tpu.memory_space<vmem>>, vector<16x32xbf16>
      %17 = arith.extf %16 : vector<16x32xbf16> to vector<16x32xf32>
      %18 = arith.addf %15, %17 : vector<16x32xf32>
      %cst_16 = arith.constant dense<0.000000e+00> : vector<16xf32>
      %19 = vector.multi_reduction <add>, %18, %cst_16 [1] : vector<16x32xf32> to vector<16xf32>
      %20 = vector.shape_cast %19 : vector<16xf32> to vector<16x1xf32>
      %cst_17 = arith.constant 3.200000e+01 : f32
      %21 = vector.broadcast %cst_17 : f32 to vector<16x1xf32>
      %22 = arith.divf %20, %21 : vector<16x1xf32>
      %23 = vector.broadcast %22 : vector<16x1xf32> to vector<16x32xf32>
      %24 = arith.subf %18, %23 : vector<16x32xf32>
      %25 = arith.mulf %24, %24 : vector<16x32xf32>
      %cst_18 = arith.constant dense<0.000000e+00> : vector<16xf32>
      %26 = vector.multi_reduction <add>, %25, %cst_18 [1] : vector<16x32xf32> to vector<16xf32>
      %27 = vector.shape_cast %26 : vector<16xf32> to vector<16x1xf32>
      %cst_19 = arith.constant 3.200000e+01 : f32
      %28 = vector.broadcast %cst_19 : f32 to vector<16x1xf32>
      %29 = arith.divf %27, %28 : vector<16x1xf32>
      %cst_20 = arith.constant 9.99999996E-13 : f32
      %30 = vector.broadcast %cst_20 : f32 to vector<16x1xf32>
      %31 = arith.addf %29, %30 : vector<16x1xf32>
      %32 = math.rsqrt %31 : vector<16x1xf32>
      %33 = vector.broadcast %22 : vector<16x1xf32> to vector<16x32xf32>
      %34 = arith.subf %18, %33 : vector<16x32xf32>
      %35 = vector.broadcast %32 : vector<16x1xf32> to vector<16x32xf32>
      %36 = arith.mulf %34, %35 : vector<16x32xf32>
      %c0_21 = arith.constant 0 : index
      %c0_22 = arith.constant 0 : index
      %37 = vector.load %arg6[%c0_21, %c0_22] : memref<1x32xf32, #tpu.memory_space<vmem>>, vector<1x32xf32>
      %38 = vector.broadcast %37 : vector<1x32xf32> to vector<16x32xf32>
      %39 = arith.mulf %36, %38 : vector<16x32xf32>
      %c0_23 = arith.constant 0 : index
      %c0_24 = arith.constant 0 : index
      %40 = vector.load %arg7[%c0_23, %c0_24] : memref<1x32xf32, #tpu.memory_space<vmem>>, vector<1x32xf32>
      %41 = vector.broadcast %40 : vector<1x32xf32> to vector<16x32xf32>
      %42 = arith.addf %39, %41 : vector<16x32xf32>
      %43 = arith.truncf %42 : vector<16x32xf32> to vector<16x32xbf16>
      %c0_25 = arith.constant 0 : index
      %c0_26 = arith.constant 0 : index
      %44 = vector.load %arg8[%c0_25, %c0_26] : memref<16x32xbf16, #tpu.memory_space<vmem>>, vector<16x32xbf16>
      tpu.vector_store %arg8[%c0_25, %c0_26], %43 {strides = array<i32>} : memref<16x32xbf16, #tpu.memory_space<vmem>>, vector<16x32xbf16>,
    } else {
    }
    return
  }
  func.func @transform_0(%arg0: i32, %arg1: i32) -> (i32, i32) {
    %c0_i32 = arith.constant 0 : i32
    return %arg0, %arg1 : i32, i32
  }
  func.func @transform_1(%arg0: i32, %arg1: i32) -> (i32, i32) {
    %c0_i32 = arith.constant 0 : i32
    %c0_i32_0 = arith.constant 0 : i32
    return %arg1, %c0_i32 : i32, i32
  }
  func.func @transform_2(%arg0: i32, %arg1: i32) -> (i32, i32) {
    %c0_i32 = arith.constant 0 : i32
    %c0_i32_0 = arith.constant 0 : i32
    %c0_i32_1 = arith.constant 0 : i32
    return %c0_i32, %c0_i32_0 : i32, i32
  }
  func.func @transform_3(%arg0: i32, %arg1: i32) -> (i32, i32) {
    %c0_i32 = arith.constant 0 : i32
    %c0_i32_0 = arith.constant 0 : i32
    return %arg0, %c0_i32 : i32, i32
  }
  func.func @transform_4(%arg0: i32, %arg1: i32) -> (i32, i32) {
    %c0_i32 = arith.constant 0 : i32
    %c0_i32_0 = arith.constant 0 : i32
    %c0_i32_1 = arith.constant 0 : i32
    return %c0_i32, %c0_i32_0 : i32, i32
  }
  func.func @transform_5(%arg0: i32, %arg1: i32) -> (i32, i32) {
    %c0_i32 = arith.constant 0 : i32
    %c0_i32_0 = arith.constant 0 : i32
    %c0_i32_1 = arith.constant 0 : i32
    return %c0_i32, %c0_i32_0 : i32, i32
  }
  func.func @transform_6(%arg0: i32, %arg1: i32) -> (i32, i32) {
    %c0_i32 = arith.constant 0 : i32
    %c0_i32_0 = arith.constant 0 : i32
    return %arg0, %c0_i32 : i32, i32
  }
}

module attributes {stable_mosaic.version = 11 : i64} {
  func.func @_classifier_kernel(%arg0: memref<2x32xbf16, #tpu.memory_space<vmem>>, %arg1: memref<32x128xbf16, #tpu.memory_space<vmem>>, %arg2: memref<1x128xf32, #tpu.memory_space<vmem>>, %arg3: memref<2x128xf32, #tpu.memory_space<vmem>>) attributes {dimension_semantics = [], scalar_prefetch = 0 : i64, scratch_operands = 0 : i64, tpu.core_type = #tpu.core_type<tc>} {
    %c0 = arith.constant 0 : index
    %c0_0 = arith.constant 0 : index
    %0 = vector.load %arg0[%c0, %c0_0] : memref<2x32xbf16, #tpu.memory_space<vmem>>, vector<2x32xbf16>
    %c0_1 = arith.constant 0 : index
    %c0_2 = arith.constant 0 : index
    %1 = vector.load %arg1[%c0_1, %c0_2] : memref<32x128xbf16, #tpu.memory_space<vmem>>, vector<32x128xbf16>
    %cst = arith.constant dense<0.000000e+00> : vector<2x128xf32>
    %2 = tpu.matmul %0, %1, %cst {dimension_numbers = #tpu.dot_dimension_numbers<[1], [0], [0], [1], [0, 0, 1, 1], [], []>} : vector<2x32xbf16>, vector<32x128xbf16>, vector<2x128xf32> -> vector<2x128xf32>
    %c0_3 = arith.constant 0 : index
    %c0_4 = arith.constant 0 : index
    %3 = vector.load %arg2[%c0_3, %c0_4] : memref<1x128xf32, #tpu.memory_space<vmem>>, vector<1x128xf32>
    %4 = vector.broadcast %3 : vector<1x128xf32> to vector<2x128xf32>
    %5 = arith.addf %2, %4 : vector<2x128xf32>
    %c0_5 = arith.constant 0 : index
    %c0_6 = arith.constant 0 : index
    %6 = vector.load %arg3[%c0_5, %c0_6] : memref<2x128xf32, #tpu.memory_space<vmem>>, vector<2x128xf32>
    tpu.vector_store %arg3[%c0_5, %c0_6], %5 {strides = array<i32>} : memref<2x128xf32, #tpu.memory_space<vmem>>, vector<2x128xf32>,
    return
  }
}

</mosaic_0001>

<bundles_post_ra>
// kernel: bert_classification.12
= control target key start
LH: loop header
LB: loop body
LE: loop exit
PB: predicated region body
PF: predicated region fallthrough
CT: control target
= control target key end

     0   :  { %vm16_vm0 = vcmask 261120   ;;  %v98_v4 = vmov 32.0   ;;  %vm82_vm6 = vcmask 257024   ;;  %s141_s0 = inlined_call_operand.vmem [shape: f32[16,32], index: 0, kind: input, shape index: {}]   ;;  %s142_s1 = inlined_call_operand.vmem [shape: f32[1,32], index: 1, kind: input, shape index: {}]   ;;  %s143_s2 = inlined_call_operand.vmem [shape: f32[1,32], index: 2, kind: input, shape index: {}]   ;;  %s144_s3 = inlined_call_operand.vmem [shape: bf16[16,32], index: 3, kind: output, shape index: {}]  }
   0x1   :  { %v14_v0 = vld [vmem:[%s141_s0] sm:$0xff]  ;;  %v15_v2 = vld [vmem:[%s141_s0 + $0x8] sm:$0xff]  ;;  %92 = vrcp.f32 %v98_v4 }
   0x2   :  { %v17_v1 = vsel %vm16_vm0, %v14_v0, 0.0  ;;  %v20_v3 = vsel %vm16_vm0, %v15_v2, 0.0  ;;  %v90_v35 = vld [vmem:[%s142_s1] ss:$0 sm:$0xff] }
   0x3   :  { %18 = vadd.xlane.f32.xlu0 %v17_v1  ;;  %v91_v38 = vld [vmem:[%s143_s2] ss:$0 sm:$0xff] }
   0x7   :  { %v93_v5 = vpop.eup %92 }
   0x8   :  { %v24_v6 = vmul.f32 32.0, %v93_v5  ;;  %vm28_vm1 = vweird.f32 %v93_v5 }
   0xa   :  { %v25_v7 = vsub.f32 1.0, %v24_v6 }
   0xb   :  { %21 = vadd.xlane.f32.xlu0 %v20_v3 }
   0xc   :  { %v26_v8 = vmul.f32 %v93_v5, %v25_v7 }
   0xe   :  { %v27_v9 = vadd.f32 %v93_v5, %v26_v8 }
  0x10   :  { %v29_v10 = vsel %vm28_vm1, %v93_v5, %v27_v9 }
  0x76   :  { %v19_v11 = vpop.xlane.xlu0 %18 }
  0x77   :  { %v30_v12 = vmul.f32 %v29_v10, %v19_v11 }
  0x79   :  { %v32_v13 = vsub.f32 %v14_v0, %v30_v12 }
  0x7b   :  { %v34_v14 = vmul.f32 %v32_v13, %v32_v13 }
  0x7d   :  { %v36_v15 = vsel %vm16_vm0, %v34_v14, 0.0 }
  0x7e   :  { %37 = vadd.xlane.f32.xlu1 %v36_v15  ;;  %v22_v16 = vpop.xlane.xlu0 %21 }
  0x7f   :  { %v31_v17 = vmul.f32 %v29_v10, %v22_v16 }
  0x81   :  { %v33_v18 = vsub.f32 %v15_v2, %v31_v17 }
  0x83   :  { %v35_v19 = vmul.f32 %v33_v18, %v33_v18 }
  0x85   :  { %v39_v20 = vsel %vm16_vm0, %v35_v19, 0.0 }
  0x86   :  { %40 = vadd.xlane.f32.xlu1 %v39_v20 }
  0xf1   :  { %v38_v21 = vpop.xlane.xlu1 %37 }
  0xf2   :  { %v42_v22 = vmul.f32 %v38_v21, %v29_v10 }
  0xf4   :  { %v44_v23 = vadd.f32 1e-12, %v42_v22 }
  0xf6   :  { %94 = vrsqrt.f32 %v44_v23  ;;  %vm52_vm3 = vweird.f32 %v44_v23 }
  0xf9   :  { %v41_v24 = vpop.xlane.xlu1 %40 }
  0xfa   :  { %v43_v25 = vmul.f32 %v41_v24, %v29_v10 }
  0xfc   :  { %v95_v26 = vpop.eup %94  ;;  %v45_v27 = vadd.f32 1e-12, %v43_v25 }
  0xfd   :  { %v47_v28 = vmul.f32 %v95_v26, %v44_v23  ;;  %vm53_vm2 = vweird.f32 %v95_v26 }
  0xfe   :  { %96 = vrsqrt.f32 %v45_v27  ;;  %vm54_vm4 = vmor %vm52_vm3, %vm53_vm2  ;;  %vm62_vm7 = vweird.f32 %v45_v27 }
  0xff   :  { %v48_v29 = vmul.f32 %v95_v26, %v47_v28 }
 0x101   :  { %v49_v30 = vmul.f32 0.5, %v48_v29 }
 0x103   :  { %v50_v31 = vsub.f32 1.5, %v49_v30 }
 0x104   :  { %v97_v32 = vpop.eup %96 }
 0x105   :  { %v51_v33 = vmul.f32 %v95_v26, %v50_v31  ;;  %v57_v34 = vmul.f32 %v97_v32, %v45_v27  ;;  %vm63_vm5 = vweird.f32 %v97_v32 }
 0x106   :  { %vm64_vm8 = vmor %vm62_vm7, %vm63_vm5 }
 0x107   :  { %v55_v36 = vsel %vm54_vm4, %v95_v26, %v51_v33  ;;  %v58_v37 = vmul.f32 %v97_v32, %v57_v34 }
 0x108   :  { %v66_v39 = vmul.f32 %v55_v36, %v32_v13 }
 0x109   :  { %v59_v40 = vmul.f32 0.5, %v58_v37 }
 0x10a   :  { %v72_v41 = vmul.f32 %v90_v35, %v66_v39 }
 0x10b   :  { %v60_v42 = vsub.f32 1.5, %v59_v40 }
 0x10c   :  { %v78_v43 = vadd.f32 %v91_v38, %v72_v41 }
 0x10d   :  { %v61_v44 = vmul.f32 %v97_v32, %v60_v42 }
 0x10e   :  { %v80_v45 = vpack.c.bf16 %v78_v43, %v78_v43 }
 0x10f   :  { %v65_v46 = vsel %vm64_vm8, %v97_v32, %v61_v44 }
 0x110   :  { %83 = vst.msk [vmem:[%s144_s3] sm:$0xf] %vm82_vm6, %v80_v45  ;;  %v67_v47 = vmul.f32 %v65_v46, %v33_v18 }
 0x112   :  { %v73_v48 = vmul.f32 %v90_v35, %v67_v47 }
 0x114   :  { %v79_v49 = vadd.f32 %v91_v38, %v73_v48 }
 0x116   :  { %v81_v50 = vpack.c.bf16 %v79_v49, %v79_v49 }
 0x118   :  { %84 = vst.msk [vmem:[%s144_s3 + $0x4] sm:$0xf] %vm82_vm6, %v81_v50 }

// kernel: bert_classification.13
= control target key start
LH: loop header
LB: loop body
LE: loop exit
PB: predicated region body
PF: predicated region fallthrough
CT: control target
= control target key end

     0   :  { %vm19_vm0 = vcmask 785408   ;;  %v108_v1 = vmov 0.0   ;;  %vm47_vm1 = vcmask 261120   ;;  %vm83_vm2 = vcmask 781312   ;;  %s151_s1 = inlined_call_operand.vmem [shape: bf16[32,96], index: 1, kind: input, shape index: {}]   ;;  %s152_s2 = inlined_call_operand.vmem [shape: f32[1,96], index: 2, kind: input, shape index: {}]   ;;  %s153_s0 = inlined_call_operand.vmem [shape: bf16[16,32], index: 0, kind: input, shape index: {}]   ;;  %s154_s3 = inlined_call_operand.vmem [shape: bf16[16,96], index: 3, kind: output, shape index: {}]  }
   0x1   :  { %v105_v0 = vld [vmem:[%s151_s1 + $0x8] sm:$0xff]  ;;  %20 = vst.msk [vmem:[#allocation2] sm:$0xff] %vm19_vm0, %v108_v1  ;;  %v104_v2 = vld [vmem:[%s151_s1] sm:$0xff] }
   0x2   :  { %21 = vst.msk [vmem:[#allocation2 + $0x8] sm:$0xff] %vm19_vm0, %v108_v1  ;;  %57 = vmatpush.bf16.msra.mxu0 %v105_v0  ;;  %v103_v3 = vld [vmem:[%s153_s0] sm:$0xff] }
   0x3   :  { %v107_v8 = vld [vmem:[%s152_s2] ss:$0 sm:$0xff] }
   0x6   :  { %58 = vmatpush.bf16.msra.mxu0 %v104_v2 }
   0x8   :  { %v22_v4 = vld [vmem:[#allocation2] sm:$0xff] }
   0x9   :  { %102 = vmatmul.msk.bf16.vlgmr.msra.gmra.mxu0 %vm47_vm1, %v103_v3  ;;  %v23_v7 = vld [vmem:[#allocation2 + $0x8] sm:$0xff] }
  0x86   :  { %v60_v5 = vpop.f32.mrf.mxu0 }
  0x87   :  { %v65_v6 = vadd.f32 %v60_v5, %v22_v4 }
  0x89   :  { %68 = vst.msk [vmem:[#allocation2] sm:$0xff] %vm19_vm0, %v65_v6 }
  0x8e   :  { %v62_v9 = vpop.f32.mrf.mxu0 }
  0x8f   :  { %v66_v10 = vadd.f32 %v62_v9, %v23_v7 }
  0x90   :  { %v73_v11 = vld [vmem:[#allocation2] sm:$0xff] }
  0x91   :  { %v79_v12 = vadd.f32 %v107_v8, %v73_v11  ;;  %69 = vst.msk [vmem:[#allocation2 + $0x8] sm:$0xff] %vm19_vm0, %v66_v10 }
  0x93   :  { %v81_v13 = vpack.c.bf16 %v79_v12, %v79_v12 }
  0x95   :  { %84 = vst.msk [vmem:[%s154_s3] sm:$0xf] %vm83_vm2, %v81_v13 }
  0x98   :  { %v74_v14 = vld [vmem:[#allocation2 + $0x8] sm:$0xff] }
  0x99   :  { %v80_v15 = vadd.f32 %v107_v8, %v74_v14 }
  0x9b   :  { %v82_v16 = vpack.c.bf16 %v80_v15, %v80_v15 }
  0x9d   :  { %85 = vst.msk [vmem:[%s154_s3 + $0x4] sm:$0xf] %vm83_vm2, %v82_v16 }

// kernel: bert_classification.15
= control target key start
LH: loop header
LB: loop body
LE: loop exit
PB: predicated region body
PF: predicated region fallthrough
CT: control target
= control target key end

     0   :  { %vm28_vm0 = vcmask 261120   ;;  %v198_v1 = vmov 0.0   ;;  %v199_v22 = vmov 32.0   ;;  %vm160_vm6 = vcmask 257024   ;;  %s271_s1 = inlined_call_operand.vmem [shape: bf16[32,32], index: 1, kind: input, shape index: {}]   ;;  %s272_s0 = inlined_call_operand.vmem [shape: bf16[16,32], index: 0, kind: input, shape index: {}]   ;;  %s273_s2 = inlined_call_operand.vmem [shape: f32[1,32], index: 2, kind: input, shape index: {}]   ;;  %s274_s3 = inlined_call_operand.vmem [shape: bf16[16,32], index: 3, kind: input, shape index: {}]   ;;  %s275_s4 = inlined_call_operand.vmem [shape: f32[1,32], index: 4, kind: input, shape index: {}]   ;;  %s276_s5 = inlined_call_operand.vmem [shape: f32[1,32], index: 5, kind: input, shape index: {}]   ;;  %s277_s6 = inlined_call_operand.vmem [shape: bf16[16,32], index: 6, kind: output, shape index: {}]  }
   0x1   :  { %v182_v0 = vld [vmem:[%s271_s1 + $0x8] sm:$0xff]  ;;  %29 = vst.msk [vmem:[#allocation2] sm:$0xff] %vm28_vm0, %v198_v1  ;;  %v181_v2 = vld [vmem:[%s271_s1] sm:$0xff]  ;;  %192 = vrcp.f32 %v199_v22 }
   0x2   :  { %30 = vst.msk [vmem:[#allocation2 + $0x8] sm:$0xff] %vm28_vm0, %v198_v1  ;;  %66 = vmatpush.bf16.msra.mxu0 %v182_v0  ;;  %v180_v3 = vld [vmem:[%s272_s0] sm:$0xff] }
   0x3   :  { %v184_v8 = vld [vmem:[%s274_s3] sm:$0xff]  }
   0x4   :  { %v189_v9 = vld [vmem:[%s273_s2] ss:$0 sm:$0xff]  ;;  %v185_v12 = vunpack.c.l.bf16 %v184_v8  ;;  %v186_v17 = vunpack.c.h.bf16 %v184_v8 }
   0x5   :  { %v190_v53 = vld [vmem:[%s275_s4] ss:$0 sm:$0xff] }
   0x6   :  { %67 = vmatpush.bf16.msra.mxu0 %v181_v2  ;;  %v191_v56 = vld [vmem:[%s276_s5] ss:$0 sm:$0xff] }
   0x7   :  { %v193_v23 = vpop.eup %192 }
   0x8   :  { %v31_v4 = vld [vmem:[#allocation2] sm:$0xff]  ;;  %v102_v24 = vmul.f32 32.0, %v193_v23  ;;  %vm106_vm1 = vweird.f32 %v193_v23 }
   0x9   :  { %179 = vmatmul.msk.bf16.vlgmr.msra.gmra.mxu0 %vm28_vm0, %v180_v3  ;;  %v32_v7 = vld [vmem:[#allocation2 + $0x8] sm:$0xff] }
   0xa   :  { %v103_v25 = vsub.f32 1.0, %v102_v24 }
   0xc   :  { %v104_v26 = vmul.f32 %v193_v23, %v103_v25 }
   0xe   :  { %v105_v27 = vadd.f32 %v193_v23, %v104_v26 }
  0x10   :  { %v107_v28 = vsel %vm106_vm1, %v193_v23, %v105_v27 }
  0x86   :  { %v69_v5 = vpop.f32.mrf.mxu0 }
  0x87   :  { %v74_v6 = vadd.f32 %v69_v5, %v31_v4 }
  0x89   :  { %76 = vst.msk [vmem:[#allocation2] sm:$0xff] %vm28_vm0, %v74_v6 }
  0x8e   :  { %v71_v10 = vpop.f32.mrf.mxu0 }
  0x8f   :  { %v75_v11 = vadd.f32 %v71_v10, %v32_v7 }
  0x90   :  { %v81_v13 = vld [vmem:[#allocation2] sm:$0xff] }
  0x91   :  { %77 = vst.msk [vmem:[#allocation2 + $0x8] sm:$0xff] %vm28_vm0, %v75_v11  ;;  %v87_v14 = vadd.f32 %v189_v9, %v81_v13 }
  0x93   :  { %v93_v15 = vadd.f32 %v185_v12, %v87_v14 }
  0x95   :  { %v95_v16 = vsel %vm28_vm0, %v93_v15, 0.0 }
  0x96   :  { %96 = vadd.xlane.f32.xlu0 %v95_v16 }
  0x98   :  { %v82_v18 = vld [vmem:[#allocation2 + $0x8] sm:$0xff] }
  0x99   :  { %v88_v19 = vadd.f32 %v189_v9, %v82_v18 }
  0x9b   :  { %v94_v20 = vadd.f32 %v186_v17, %v88_v19 }
  0x9d   :  { %v98_v21 = vsel %vm28_vm0, %v94_v20, 0.0 }
  0x9e   :  { %99 = vadd.xlane.f32.xlu0 %v98_v21 }
 0x109   :  { %v97_v29 = vpop.xlane.xlu0 %96 }
 0x10a   :  { %v108_v30 = vmul.f32 %v107_v28, %v97_v29 }
 0x10c   :  { %v110_v31 = vsub.f32 %v93_v15, %v108_v30 }
 0x10e   :  { %v112_v32 = vmul.f32 %v110_v31, %v110_v31 }
 0x110   :  { %v114_v33 = vsel %vm28_vm0, %v112_v32, 0.0 }
 0x111   :  { %115 = vadd.xlane.f32.xlu1 %v114_v33  ;;  %v100_v34 = vpop.xlane.xlu0 %99 }
 0x112   :  { %v109_v35 = vmul.f32 %v107_v28, %v100_v34 }
 0x114   :  { %v111_v36 = vsub.f32 %v94_v20, %v109_v35 }
 0x116   :  { %v113_v37 = vmul.f32 %v111_v36, %v111_v36 }
 0x118   :  { %v117_v38 = vsel %vm28_vm0, %v113_v37, 0.0 }
 0x119   :  { %118 = vadd.xlane.f32.xlu1 %v117_v38 }
 0x184   :  { %v116_v39 = vpop.xlane.xlu1 %115 }
 0x185   :  { %v120_v40 = vmul.f32 %v116_v39, %v107_v28 }
 0x187   :  { %v122_v41 = vadd.f32 1e-12, %v120_v40 }
 0x189   :  { %194 = vrsqrt.f32 %v122_v41  ;;  %vm130_vm3 = vweird.f32 %v122_v41 }
 0x18c   :  { %v119_v42 = vpop.xlane.xlu1 %118 }
 0x18d   :  { %v121_v43 = vmul.f32 %v119_v42, %v107_v28 }
 0x18f   :  { %v195_v44 = vpop.eup %194  ;;  %v123_v45 = vadd.f32 1e-12, %v121_v43 }
 0x190   :  { %v125_v46 = vmul.f32 %v195_v44, %v122_v41  ;;  %vm131_vm2 = vweird.f32 %v195_v44 }
 0x191   :  { %196 = vrsqrt.f32 %v123_v45  ;;  %vm132_vm4 = vmor %vm130_vm3, %vm131_vm2  ;;  %vm140_vm7 = vweird.f32 %v123_v45 }
 0x192   :  { %v126_v47 = vmul.f32 %v195_v44, %v125_v46 }
 0x194   :  { %v127_v48 = vmul.f32 0.5, %v126_v47 }
 0x196   :  { %v128_v49 = vsub.f32 1.5, %v127_v48 }
 0x197   :  { %v197_v50 = vpop.eup %196 }
 0x198   :  { %v129_v51 = vmul.f32 %v195_v44, %v128_v49  ;;  %v135_v52 = vmul.f32 %v197_v50, %v123_v45  ;;  %vm141_vm5 = vweird.f32 %v197_v50 }
 0x199   :  { %vm142_vm8 = vmor %vm140_vm7, %vm141_vm5 }
 0x19a   :  { %v133_v54 = vsel %vm132_vm4, %v195_v44, %v129_v51  ;;  %v136_v55 = vmul.f32 %v197_v50, %v135_v52 }
 0x19b   :  { %v144_v57 = vmul.f32 %v133_v54, %v110_v31 }
 0x19c   :  { %v137_v58 = vmul.f32 0.5, %v136_v55 }
 0x19d   :  { %v150_v59 = vmul.f32 %v190_v53, %v144_v57 }
 0x19e   :  { %v138_v60 = vsub.f32 1.5, %v137_v58 }
 0x19f   :  { %v156_v61 = vadd.f32 %v191_v56, %v150_v59 }
 0x1a0   :  { %v139_v62 = vmul.f32 %v197_v50, %v138_v60 }
 0x1a1   :  { %v158_v63 = vpack.c.bf16 %v156_v61, %v156_v61 }
 0x1a2   :  { %v143_v0 = vsel %vm142_vm8, %v197_v50, %v139_v62 }
 0x1a3   :  { %161 = vst.msk [vmem:[%s277_s6] sm:$0xf] %vm160_vm6, %v158_v63  ;;  %v145_v1 = vmul.f32 %v143_v0, %v111_v36 }
 0x1a5   :  { %v151_v2 = vmul.f32 %v190_v53, %v145_v1 }
 0x1a7   :  { %v157_v3 = vadd.f32 %v191_v56, %v151_v2 }
 0x1a9   :  { %v159_v4 = vpack.c.bf16 %v157_v3, %v157_v3 }
 0x1ab   :  { %162 = vst.msk [vmem:[%s277_s6 + $0x4] sm:$0xf] %vm160_vm6, %v159_v4 }

// kernel: bert_classification.14
= control target key start
LH: loop header
LB: loop body
LE: loop exit
PB: predicated region body
PF: predicated region fallthrough
CT: control target
= control target key end

     0   :  { %s569_s9 = smov 0   ;;  %s638_s0 = inlined_call_operand.vmem [shape: bf16[2,8,96], index: 0, kind: input, shape index: {}]   ;;  %s639_s1 = inlined_call_operand.vmem [shape: f32[2,1,8], index: 1, kind: input, shape index: {}]   ;;  %s640_s2 = inlined_call_operand.vmem [shape: bf16[2,8,32], index: 2, kind: output, shape index: {}]  }
   0x1 LB: > { %s476_s10 = sadd.s32 4294967295, %s538_s9   ;;  %p480_p0 = scmp.ge.s32.totalorder %s538_s9, 1  ;;  %s538_s9 = sphi %s569_s9, %s12_s9  }
   0x2   : > { %p119_p1 = scmp.lt.s32.totalorder %s538_s9, 3 }
   0x4   : > { %p120_p2 = pnand %p480_p0, %p119_p1 }
   0x5   : > { %p142_p3 = scmp.lt.s32.totalorder (!%p120_p2), %s476_s10, 1  ;;  %s540_s15 = smov (!%p120_p2), 96  }
   0x6   : > { %123 = sbr.rel (%p120_p2) target bundleno = 1201 (0x4b1), region = 28  ;;  %s541_s16 = smov (!%p120_p2), 88  }
   0x7   : > { %s542_s20 = smov (!%p120_p2), 120   ;;  %s543_s21 = smov (!%p120_p2), 64  }
   0x8   : > { %s544_s22 = smov (!%p120_p2), 80   ;;  %s545_s23 = smov (!%p120_p2), 72  }
   0x9   : > { %s546_s24 = smov (!%p120_p2), 112   ;;  %s547_s25 = smov (!%p120_p2), 104  }
   0xa   : > { %s548_s26 = smov (!%p120_p2), 56   ;;  %s549_s27 = smov (!%p120_p2), 40  }
   0xb   : > { %s642_s10 = smov (!%p142_p3, %s476_s10), 1  ;;  %vm161_vm0 = vcmask 64512   ;;  %vm203_vm1 = vcmask 1043456   ;;  %s550_s28 = smov 48   ;;  %vm407_vm2 = vcmask 130048   ;;  %vm409_vm3 = vcmask 195584  }
   0xc   : > { %s481_s11 = sshll.u32 %s642_s10, 2  ;;  %s148_s19 = scalar_lea.vmem %s639_s1, %s642_s10  ;;  %vm412_vm4 = vcmask 257024  }
   0xd   : > { %s145_s14 = scalar_lea.vmem %s638_s0, %s481_s11  ;;  %v515_v8 = vld [vmem:[%s148_s19] ss:$0 sm:$0xff]  ;;  %s551_s29 = smov 8  }
   0xe   : > { %v154_v0 = vld [vmem:[%s145_s14] sm:$0xf]  ;;  %s552_s30 = smov 16   ;;  %s553_s3 = smov 24  }
   0xf   : > { %v157_v1 = vunpack.c.l.b16 %v154_v0  ;;  %s152_s6 = scalar_lea.vmem %s640_s2, %s481_s11 }
  0x11   : > { %v585_v2 = vpack.c.b16 %v157_v1, %v157_v1 }
  0x13   : > { %159 = vrot.lane.b32.xlu0 %v585_v2, %s540_s15  ;;  %222 = vrot.lane.b32.xlu1 %v585_v2, %s541_s16 }
  0x14   : > { %220 = vrot.lane.b32.xlu2 %v585_v2, %s542_s20 }
  0x1c   : > { %198 = vrot.lane.b32.xlu2 %v585_v2, %s543_s21 }
  0x24   : > { %280 = vrot.lane.b32.xlu2 %v585_v2, %s544_s22 }
  0x2c   : > { %338 = vrot.lane.b32.xlu2 %v585_v2, %s545_s23 }
  0x34   : > { %278 = vrot.lane.b32.xlu2 %v585_v2, %s546_s24 }
  0x3c   : > { %336 = vrot.lane.b32.xlu2 %v585_v2, %s547_s25 }
  0x6e   : > { %v221_v7 = vpop.permute.xlu2 %220 }
  0x76   : > { %v199_v14 = vpop.permute.xlu2 %198 }
  0x77   : > { %v205_v19 = vsel %vm203_vm1, %v199_v14, 0 }
  0x78   : > { %214 = vmatpush.bf16.msra.mxu1 %v205_v19 }
  0x7e   : > { %v281_v15 = vpop.permute.xlu2 %280 }
  0x7f   : > { %v286_v17 = vsel %vm161_vm0, %v281_v15, 0 }
  0x80   : > { %295 = vmatpush.bf16.xpose.msrb.mxu1 %v286_v17 }
  0x85   : > { %v160_v3 = vpop.permute.xlu0 %159  ;;  %v223_v5 = vpop.permute.xlu1 %222 }
  0x86   : > { %v166_v4 = vsel %vm161_vm0, %v160_v3, 0  ;;  %v228_v6 = vsel %vm161_vm0, %v223_v5, 0  ;;  %v339_v16 = vpop.permute.xlu2 %338 }
  0x87   : > { %175 = vmatpush.bf16.xpose.msra.mxu0 %v166_v4  ;;  %237 = vmatpush.bf16.xpose.msra.mxu2 %v228_v6  ;;  %v344_v18 = vsel %vm161_vm0, %v339_v16, 0 }
  0x8e   : > { %483 = vmatmul.msk.bf16.vlgmr.msra.gmra.mxu0 %vm161_vm0, %v154_v0  ;;  %485 = vmatmul.msk.bf16.vlgmr.msra.gmra.mxu2 %vm161_vm0, %v221_v7  ;;  %v279_v20 = vpop.permute.xlu2 %278 }
  0x8f   : > { %353 = vmatpush.bf16.xpose.msrb.mxu0 %v344_v18 }
  0x96   : > { %v337_v23 = vpop.permute.xlu2 %336 }
  0x9e   : > { %489 = vmatmul.msk.bf16.vlgmr.msrb.gmra.mxu0 %vm161_vm0, %v337_v23 }
 0x10b   : > { %v177_v9 = vpop.f32.mrf.mxu0 }
 0x10c   : > { %v181_v10 = vmul.f32 0.35355338, %v177_v9 }
 0x10e   : > { %v185_v11 = vadd.f32 %v515_v8, %v181_v10 }
 0x110   : > { %v186_v12 = vsel %vm161_vm0, %v185_v11, -inf }
 0x111   : > { %187 = vmax.xlane.f32.xlu0 %v186_v12  ;;  %v239_v21 = vpop.f32.mrf.mxu2 }
 0x112   : > { %v243_v22 = vmul.f32 0.35355338, %v239_v21 }
 0x113   : > { %v179_v13 = vpop.f32.mrf.mxu0 }
 0x114   : > { %v244_v24 = vadd.f32 %v515_v8, %v243_v22 }
 0x116   : > { %v245_v26 = vsel %vm161_vm0, %v244_v24, -inf }
 0x117   : > { %246 = vmax.xlane.f32.xlu2 %v245_v26 }
 0x119   : > { %v241_v29 = vpop.f32.mrf.mxu2 }
 0x11b   : > { %v355_v32 = vpop.f32.mrf.mxu0 }
 0x11c   : > { %v359_v33 = vmul.f32 0.35355338, %v355_v32 }
 0x11e   : > { %v360_v34 = vadd.f32 %v515_v8, %v359_v33 }
 0x120   : > { %v361_v36 = vsel %vm161_vm0, %v360_v34, -inf }
 0x123   : > { %v357_v37 = vpop.f32.mrf.mxu0 }
 0x184   : > { %v188_v25 = vpop.xlane.xlu0 %187 }
 0x185   : > { %v189_v27 = vsub.f32 %v185_v11, %v188_v25 }
 0x187   : > { %v190_v28 = vmul.f32 1.442695, %v189_v27 }
 0x189   : > { %516 = vpow2.f32 %v190_v28 }
 0x18a   : > { %v247_v43 = vpop.xlane.xlu2 %246 }
 0x18b   : > { %v248_v44 = vsub.f32 %v244_v24, %v247_v43 }
 0x18d   : > { %v249_v45 = vmul.f32 1.442695, %v248_v44 }
 0x18f   : > { %v517_v30 = vpop.eup %516 }
 0x190   : > { %v192_v31 = vsel %vm161_vm0, %v517_v30, 0.0 }
 0x191   : > { %193 = vadd.xlane.f32.xlu1 %v192_v31 }
 0x199   : > { %362 = vmax.xlane.f32.xlu1 %v361_v36 }
 0x1b2   : > { %257 = vrot.lane.b32.xlu1 %v585_v2, %s548_s26 }
 0x1ba   : > { %373 = vrot.lane.b32.xlu1 %v585_v2, %s549_s27 }
 0x204   : > { %v194_v35 = vpop.xlane.xlu1 %193 }
 0x205   : > { %518 = vrcp.f32 %v194_v35 }
 0x206   : > { %520 = vpow2.f32 %v249_v45 }
 0x20b   : > { %v519_v38 = vpop.eup %518 }
 0x20c   : > { %v196_v39 = vmul.f32 %v519_v38, %v517_v30  ;;  %v363_v47 = vpop.xlane.xlu1 %362  ;;  %v521_v54 = vpop.eup %520 }
 0x20d   : > { %v364_v50 = vsub.f32 %v360_v34, %v363_v47  ;;  %v251_v55 = vsel %vm161_vm0, %v521_v54, 0.0 }
 0x20e   : > { %v197_v40 = vpack.c.bf16 %v196_v39, %v196_v39 }
 0x20f   : > { %v365_v52 = vmul.f32 1.442695, %v364_v50 }
 0x210   : > { %484 = vmatmul.msk.bf16.vlgmr.msra.gmra.mxu1 %vm161_vm0, %v197_v40 }
 0x211   : > { %522 = vpow2.f32 %v365_v52 }
 0x217   : > { %v523_v56 = vpop.eup %522 }
 0x218   : > { %v367_v57 = vsel %vm161_vm0, %v523_v56, 0.0 }
 0x220   : > { %487 = vmatmul.msk.bf16.vlgmr.msrb.gmra.mxu1 %vm161_vm0, %v279_v20 }
 0x224   : > { %v258_v58 = vpop.permute.xlu1 %257 }
 0x225   : > { %v263_v59 = vsel %vm203_vm1, %v258_v58, 0 }
 0x226   : > { %272 = vmatpush.bf16.msra.mxu3 %v263_v59 }
 0x22c   : > { %v374_v60 = vpop.permute.xlu1 %373 }
 0x22d   : > { %v379_v61 = vsel %vm203_vm1, %v374_v60, 0 }
 0x22e   : > { %388 = vmatpush.bf16.msrb.mxu2 %v379_v61 }
 0x28d   : > { %v615_v41 = vpop.f32.mrf.mxu1 }
 0x295   : > { %v218_v42 = vpop.f32.mrf.mxu1 }
 0x29d   : > { %v297_v46 = vpop.f32.mrf.mxu1 }
 0x29e   : > { %v301_v48 = vmul.f32 0.35355338, %v297_v46 }
 0x2a0   : > { %v302_v49 = vadd.f32 %v515_v8, %v301_v48 }
 0x2a2   : > { %v303_v51 = vsel %vm161_vm0, %v302_v49, -inf }
 0x2a3   : > { %304 = vmax.xlane.f32.xlu0 %v303_v51 }
 0x2a5   : > { %v299_v53 = vpop.f32.mrf.mxu1 }
 0x2ab   : > { %252 = vadd.xlane.f32.xlu0 %v251_v55 }
 0x2b3   : > { %368 = vadd.xlane.f32.xlu0 %v367_v57 }
 0x316   : > { %v305_v62 = vpop.xlane.xlu0 %304 }
 0x317   : > { %v306_v63 = vsub.f32 %v302_v49, %v305_v62 }
 0x319   : > { %v307_v0 = vmul.f32 1.442695, %v306_v63 }
 0x31b   : > { %524 = vpow2.f32 %v307_v0 }
 0x31e   : > { %v253_v1 = vpop.xlane.xlu0 %252 }
 0x31f   : > { %526 = vrcp.f32 %v253_v1 }
 0x321   : > { %v525_v3 = vpop.eup %524 }
 0x322   : > { %v309_v4 = vsel %vm161_vm0, %v525_v3, 0.0 }
 0x323   : > { %310 = vadd.xlane.f32.xlu0 %v309_v4 }
 0x325   : > { %v527_v5 = vpop.eup %526 }
 0x326   : > { %v369_v6 = vpop.xlane.xlu0 %368  ;;  %v255_v7 = vmul.f32 %v527_v5, %v521_v54 }
 0x327   : > { %528 = vrcp.f32 %v369_v6 }
 0x328   : > { %v256_v8 = vpack.c.bf16 %v255_v7, %v255_v7 }
 0x32a   : > { %486 = vmatmul.msk.bf16.vlgmr.msra.gmra.mxu3 %vm161_vm0, %v256_v8 }
 0x32d   : > { %v529_v9 = vpop.eup %528 }
 0x32e   : > { %v371_v10 = vmul.f32 %v529_v9, %v523_v56 }
 0x330   : > { %v372_v11 = vpack.c.bf16 %v371_v10, %v371_v10 }
 0x332   : > { %490 = vmatmul.msk.bf16.vlgmr.msrb.gmra.mxu2 %vm161_vm0, %v372_v11 }
 0x337   : > { %315 = vrot.lane.b32.xlu0 %v585_v2, %s550_s28 }
 0x396   : > { %v311_v12 = vpop.xlane.xlu0 %310 }
 0x397   : > { %530 = vrcp.f32 %v311_v12 }
 0x39d   : > { %v531_v13 = vpop.eup %530 }
 0x39e   : > { %v313_v14 = vmul.f32 %v531_v13, %v525_v3 }
 0x3a0   : > { %v314_v17 = vpack.c.bf16 %v313_v14, %v313_v14 }
 0x3a9   : > { %v316_v15 = vpop.permute.xlu0 %315 }
 0x3aa   : > { %v321_v16 = vsel %vm203_vm1, %v316_v15, 0 }
 0x3ab   : > { %330 = vmatpush.bf16.msrb.mxu3 %v321_v16 }
 0x3ad   : > { %v274_v18 = vpop.f32.mrf.mxu3 }
 0x3ae   : > { %488 = vmatmul.msk.bf16.vlgmr.msrb.gmra.mxu3 %vm161_vm0, %v314_v17  ;;  %395 = vrot.lane.b32.xlu2 %v274_v18, %s551_s29 }
 0x3b5   : > { %v276_v19 = vpop.f32.mrf.mxu3  ;;  %v390_v20 = vpop.f32.mrf.mxu2 }
 0x3bd   : > { %v392_v21 = vpop.f32.mrf.mxu2 }
 0x408   : > { %v396_v24 = vpop.permute.xlu2 %395 }
 0x409   : > { %v406_v25 = vsel %vm161_vm0, %v615_v41, %v396_v24 }
 0x431   : > { %v332_v22 = vpop.f32.mrf.mxu3 }
 0x432   : > { %399 = vrot.lane.b32.xlu1 %v332_v22, %s552_s30 }
 0x439   : > { %v334_v2 = vpop.f32.mrf.mxu3 }
 0x43a   : > { %403 = vrot.lane.b32.xlu1 %v390_v20, %s553_s3 }
 0x4a4   : > { %v400_v23 = vpop.permute.xlu1 %399 }
 0x4a5   : > { %v408_v26 = vsel %vm407_vm2, %v406_v25, %v400_v23 }
 0x4ac   : > { %v404_v27 = vpop.permute.xlu1 %403 }
 0x4ad   : > { %v410_v28 = vsel %vm409_vm3, %v408_v26, %v404_v27 }
 0x4ae   : > { %v411_v29 = vpack.c.bf16 %v410_v28, %v410_v28 }
 0x4b0   : > { %413 = vst.msk [vmem:[%s152_s6] sm:$0xf] %vm412_vm4, %v411_v29 }
 0x4b1 PF: > { %s12_s9 = sadd.s32 1, %s538_s9  }
 0x4b2   : > { %p9_p4 = scmp.ge.s32.totalorder %s12_s9, 4  }
 0x4b4   :  { %11 = sbr.rel (!%p9_p4) target bundleno = 1 (0x1), region = 61 }

// kernel: bert_classification.16
= control target key start
LH: loop header
LB: loop body
LE: loop exit
PB: predicated region body
PF: predicated region fallthrough
CT: control target
= control target key end

     0   :  { %vm19_vm0 = vcmask 523264   ;;  %v130_v1 = vmov 0.0   ;;  %vm47_vm1 = vcmask 261120   ;;  %vm101_vm2 = vcmask 519168   ;;  %s173_s1 = inlined_call_operand.vmem [shape: bf16[32,64], index: 1, kind: input, shape index: {}]   ;;  %s174_s2 = inlined_call_operand.vmem [shape: f32[1,64], index: 2, kind: input, shape index: {}]   ;;  %s175_s0 = inlined_call_operand.vmem [shape: bf16[16,32], index: 0, kind: input, shape index: {}]   ;;  %s176_s3 = inlined_call_operand.vmem [shape: bf16[16,64], index: 3, kind: output, shape index: {}]  }
   0x1   :  { %v123_v0 = vld [vmem:[%s173_s1 + $0x8] sm:$0xff]  ;;  %20 = vst.msk [vmem:[#allocation2] sm:$0xff] %vm19_vm0, %v130_v1  ;;  %v122_v2 = vld [vmem:[%s173_s1] sm:$0xff] }
   0x2   :  { %21 = vst.msk [vmem:[#allocation2 + $0x8] sm:$0xff] %vm19_vm0, %v130_v1  ;;  %57 = vmatpush.bf16.msra.mxu0 %v123_v0  ;;  %v121_v3 = vld [vmem:[%s175_s0] sm:$0xff] }
   0x3   :  { %v125_v8 = vld [vmem:[%s174_s2] ss:$0 sm:$0xff] }
   0x6   :  { %58 = vmatpush.bf16.msra.mxu0 %v122_v2 }
   0x8   :  { %v22_v4 = vld [vmem:[#allocation2] sm:$0xff] }
   0x9   :  { %120 = vmatmul.msk.bf16.vlgmr.msra.gmra.mxu0 %vm47_vm1, %v121_v3  ;;  %v23_v7 = vld [vmem:[#allocation2 + $0x8] sm:$0xff] }
  0x86   :  { %v60_v5 = vpop.f32.mrf.mxu0 }
  0x87   :  { %v65_v6 = vadd.f32 %v60_v5, %v22_v4 }
  0x89   :  { %68 = vst.msk [vmem:[#allocation2] sm:$0xff] %vm19_vm0, %v65_v6 }
  0x8e   :  { %v62_v9 = vpop.f32.mrf.mxu0 }
  0x8f   :  { %v66_v10 = vadd.f32 %v62_v9, %v23_v7 }
  0x90   :  { %v73_v11 = vld [vmem:[#allocation2] sm:$0xff] }
  0x91   :  { %v79_v12 = vadd.f32 %v125_v8, %v73_v11  ;;  %69 = vst.msk [vmem:[#allocation2 + $0x8] sm:$0xff] %vm19_vm0, %v66_v10 }
  0x93   :  { %v83_v13 = vmul.f32 0.044715, %v79_v12  ;;  %v81_v26 = vmul.f32 0.5, %v79_v12 }
  0x95   :  { %v85_v14 = vmul.f32 %v83_v13, %v79_v12 }
  0x97   :  { %v87_v15 = vmul.f32 %v85_v14, %v79_v12 }
  0x98   :  { %v74_v16 = vld [vmem:[#allocation2 + $0x8] sm:$0xff] }
  0x99   :  { %v89_v17 = vadd.f32 %v87_v15, %v79_v12  ;;  %v80_v18 = vadd.f32 %v125_v8, %v74_v16 }
  0x9b   :  { %v91_v19 = vmul.f32 0.7978846, %v89_v17  ;;  %v84_v20 = vmul.f32 0.044715, %v80_v18  ;;  %v82_v31 = vmul.f32 0.5, %v80_v18 }
  0x9d   :  { %126 = vtanh.f32 %v91_v19  ;;  %v86_v21 = vmul.f32 %v84_v20, %v80_v18 }
  0x9f   :  { %v88_v22 = vmul.f32 %v86_v21, %v80_v18 }
  0xa1   :  { %v90_v23 = vadd.f32 %v88_v22, %v80_v18 }
  0xa3   :  { %v127_v24 = vpop.eup %126  ;;  %v92_v25 = vmul.f32 0.7978846, %v90_v23 }
  0xa4   :  { %v95_v27 = vadd.f32 1.0, %v127_v24 }
  0xa5   :  { %128 = vtanh.f32 %v92_v25 }
  0xa6   :  { %v97_v28 = vmul.f32 %v95_v27, %v81_v26 }
  0xa8   :  { %v99_v29 = vpack.c.bf16 %v97_v28, %v97_v28 }
  0xaa   :  { %102 = vst.msk [vmem:[%s176_s3] sm:$0xf] %vm101_vm2, %v99_v29 }
  0xab   :  { %v129_v30 = vpop.eup %128 }
  0xac   :  { %v96_v32 = vadd.f32 1.0, %v129_v30 }
  0xae   :  { %v98_v33 = vmul.f32 %v96_v32, %v82_v31 }
  0xb0   :  { %v100_v34 = vpack.c.bf16 %v98_v33, %v98_v33 }
  0xb2   :  { %103 = vst.msk [vmem:[%s176_s3 + $0x4] sm:$0xf] %vm101_vm2, %v100_v34 }

// kernel: bert_classification.17
= control target key start
LH: loop header
LB: loop body
LE: loop exit
PB: predicated region body
PF: predicated region fallthrough
CT: control target
= control target key end

     0   :  { %vm28_vm0 = vcmask 261120   ;;  %v225_v1 = vmov 0.0   ;;  %vm72_vm1 = vcmask 523264   ;;  %v226_v24 = vmov 32.0   ;;  %s303_s1 = inlined_call_operand.vmem [shape: bf16[64,32], index: 1, kind: input, shape index: {}]   ;;  %s304_s0 = inlined_call_operand.vmem [shape: bf16[16,64], index: 0, kind: input, shape index: {}]   ;;  %s305_s2 = inlined_call_operand.vmem [shape: f32[1,32], index: 2, kind: input, shape index: {}]   ;;  %s306_s3 = inlined_call_operand.vmem [shape: bf16[16,32], index: 3, kind: input, shape index: {}]   ;;  %s307_s4 = inlined_call_operand.vmem [shape: f32[1,32], index: 4, kind: input, shape index: {}]   ;;  %s308_s5 = inlined_call_operand.vmem [shape: f32[1,32], index: 5, kind: input, shape index: {}]   ;;  %s309_s6 = inlined_call_operand.vmem [shape: bf16[16,32], index: 6, kind: output, shape index: {}]  }
   0x1   :  { %v209_v0 = vld [vmem:[%s303_s1 + $0x18] sm:$0xff]  ;;  %29 = vst.msk [vmem:[#allocation2] sm:$0xff] %vm28_vm0, %v225_v1  ;;  %v208_v2 = vld [vmem:[%s303_s1 + $0x10] sm:$0xff]  ;;  %v207_v3 = vld [vmem:[%s303_s1 + $0x8] sm:$0xff]  ;;  %219 = vrcp.f32 %v226_v24  ;;  %vm177_vm7 = vcmask 257024  }
   0x2   :  { %30 = vst.msk [vmem:[#allocation2 + $0x8] sm:$0xff] %vm28_vm0, %v225_v1  ;;  %80 = vmatpush.bf16.msra.mxu0 %v209_v0  ;;  %v206_v4 = vld [vmem:[%s303_s1] sm:$0xff] }
   0x3   :  { %v205_v5 = vld [vmem:[%s304_s0] sm:$0xff] }
   0x4   :  { %v211_v10 = vld [vmem:[%s306_s3] sm:$0xff]  }
   0x5   :  { %v216_v11 = vld [vmem:[%s305_s2] ss:$0 sm:$0xff]  ;;  %v212_v14 = vunpack.c.l.bf16 %v211_v10  ;;  %v213_v19 = vunpack.c.h.bf16 %v211_v10 }
   0x6   :  { %81 = vmatpush.bf16.msra.mxu0 %v208_v2  ;;  %v217_v55 = vld [vmem:[%s307_s4] ss:$0 sm:$0xff] }
   0x7   :  { %v220_v25 = vpop.eup %219  ;;  %v218_v58 = vld [vmem:[%s308_s5] ss:$0 sm:$0xff] }
   0x8   :  { %v31_v6 = vld [vmem:[#allocation2] sm:$0xff]  ;;  %v119_v26 = vmul.f32 32.0, %v220_v25  ;;  %vm123_vm2 = vweird.f32 %v220_v25 }
   0x9   :  { %v32_v9 = vld [vmem:[#allocation2 + $0x8] sm:$0xff] }
   0xa   :  { %82 = vmatpush.bf16.msra.mxu0 %v207_v3  ;;  %v120_v27 = vsub.f32 1.0, %v119_v26 }
   0xc   :  { %v121_v28 = vmul.f32 %v220_v25, %v120_v27 }
   0xe   :  { %83 = vmatpush.bf16.msra.mxu0 %v206_v4  ;;  %v122_v29 = vadd.f32 %v220_v25, %v121_v28 }
  0x10   :  { %v124_v30 = vsel %vm123_vm2, %v220_v25, %v122_v29 }
  0x11   :  { %204 = vmatmul.msk.bf16.vlgmr.msra.gmra.mxu0 %vm72_vm1, %v205_v5 }
  0x8e   :  { %v85_v7 = vpop.f32.mrf.mxu0 }
  0x8f   :  { %v90_v8 = vadd.f32 %v85_v7, %v31_v6 }
  0x91   :  { %93 = vst.msk [vmem:[#allocation2] sm:$0xff] %vm28_vm0, %v90_v8 }
  0x96   :  { %v87_v12 = vpop.f32.mrf.mxu0 }
  0x97   :  { %v91_v13 = vadd.f32 %v87_v12, %v32_v9 }
  0x98   :  { %v98_v15 = vld [vmem:[#allocation2] sm:$0xff] }
  0x99   :  { %94 = vst.msk [vmem:[#allocation2 + $0x8] sm:$0xff] %vm28_vm0, %v91_v13  ;;  %v104_v16 = vadd.f32 %v216_v11, %v98_v15 }
  0x9b   :  { %v110_v17 = vadd.f32 %v212_v14, %v104_v16 }
  0x9d   :  { %v112_v18 = vsel %vm28_vm0, %v110_v17, 0.0 }
  0x9e   :  { %113 = vadd.xlane.f32.xlu0 %v112_v18 }
  0xa0   :  { %v99_v20 = vld [vmem:[#allocation2 + $0x8] sm:$0xff] }
  0xa1   :  { %v105_v21 = vadd.f32 %v216_v11, %v99_v20 }
  0xa3   :  { %v111_v22 = vadd.f32 %v213_v19, %v105_v21 }
  0xa5   :  { %v115_v23 = vsel %vm28_vm0, %v111_v22, 0.0 }
  0xa6   :  { %116 = vadd.xlane.f32.xlu0 %v115_v23 }
 0x111   :  { %v114_v31 = vpop.xlane.xlu0 %113 }
 0x112   :  { %v125_v32 = vmul.f32 %v124_v30, %v114_v31 }
 0x114   :  { %v127_v33 = vsub.f32 %v110_v17, %v125_v32 }
 0x116   :  { %v129_v34 = vmul.f32 %v127_v33, %v127_v33 }
 0x118   :  { %v131_v35 = vsel %vm28_vm0, %v129_v34, 0.0 }
 0x119   :  { %132 = vadd.xlane.f32.xlu1 %v131_v35  ;;  %v117_v36 = vpop.xlane.xlu0 %116 }
 0x11a   :  { %v126_v37 = vmul.f32 %v124_v30, %v117_v36 }
 0x11c   :  { %v128_v38 = vsub.f32 %v111_v22, %v126_v37 }
 0x11e   :  { %v130_v39 = vmul.f32 %v128_v38, %v128_v38 }
 0x120   :  { %v134_v40 = vsel %vm28_vm0, %v130_v39, 0.0 }
 0x121   :  { %135 = vadd.xlane.f32.xlu1 %v134_v40 }
 0x18c   :  { %v133_v41 = vpop.xlane.xlu1 %132 }
 0x18d   :  { %v137_v42 = vmul.f32 %v133_v41, %v124_v30 }
 0x18f   :  { %v139_v43 = vadd.f32 1e-12, %v137_v42 }
 0x191   :  { %221 = vrsqrt.f32 %v139_v43  ;;  %vm147_vm4 = vweird.f32 %v139_v43 }
 0x194   :  { %v136_v44 = vpop.xlane.xlu1 %135 }
 0x195   :  { %v138_v45 = vmul.f32 %v136_v44, %v124_v30 }
 0x197   :  { %v222_v46 = vpop.eup %221  ;;  %v140_v47 = vadd.f32 1e-12, %v138_v45 }
 0x198   :  { %v142_v48 = vmul.f32 %v222_v46, %v139_v43  ;;  %vm148_vm3 = vweird.f32 %v222_v46 }
 0x199   :  { %223 = vrsqrt.f32 %v140_v47  ;;  %vm149_vm5 = vmor %vm147_vm4, %vm148_vm3  ;;  %vm157_vm8 = vweird.f32 %v140_v47 }
 0x19a   :  { %v143_v49 = vmul.f32 %v222_v46, %v142_v48 }
 0x19c   :  { %v144_v50 = vmul.f32 0.5, %v143_v49 }
 0x19e   :  { %v145_v51 = vsub.f32 1.5, %v144_v50 }
 0x19f   :  { %v224_v52 = vpop.eup %223 }
 0x1a0   :  { %v146_v53 = vmul.f32 %v222_v46, %v145_v51  ;;  %v152_v54 = vmul.f32 %v224_v52, %v140_v47  ;;  %vm158_vm6 = vweird.f32 %v224_v52 }
 0x1a1   :  { %vm159_vm9 = vmor %vm157_vm8, %vm158_vm6 }
 0x1a2   :  { %v150_v56 = vsel %vm149_vm5, %v222_v46, %v146_v53  ;;  %v153_v57 = vmul.f32 %v224_v52, %v152_v54 }
 0x1a3   :  { %v161_v59 = vmul.f32 %v150_v56, %v127_v33 }
 0x1a4   :  { %v154_v60 = vmul.f32 0.5, %v153_v57 }
 0x1a5   :  { %v167_v61 = vmul.f32 %v217_v55, %v161_v59 }
 0x1a6   :  { %v155_v62 = vsub.f32 1.5, %v154_v60 }
 0x1a7   :  { %v173_v63 = vadd.f32 %v218_v58, %v167_v61 }
 0x1a8   :  { %v156_v0 = vmul.f32 %v224_v52, %v155_v62 }
 0x1a9   :  { %v175_v1 = vpack.c.bf16 %v173_v63, %v173_v63 }
 0x1aa   :  { %v160_v2 = vsel %vm159_vm9, %v224_v52, %v156_v0 }
 0x1ab   :  { %178 = vst.msk [vmem:[%s309_s6] sm:$0xf] %vm177_vm7, %v175_v1  ;;  %v162_v3 = vmul.f32 %v160_v2, %v128_v38 }
 0x1ad   :  { %v168_v4 = vmul.f32 %v217_v55, %v162_v3 }
 0x1af   :  { %v174_v5 = vadd.f32 %v218_v58, %v168_v4 }
 0x1b1   :  { %v176_v6 = vpack.c.bf16 %v174_v5, %v174_v5 }
 0x1b3   :  { %179 = vst.msk [vmem:[%s309_s6 + $0x4] sm:$0xf] %vm177_vm7, %v176_v6 }

// kernel: bert_classification.23
= control target key start
LH: loop header
LB: loop body
LE: loop exit
PB: predicated region body
PF: predicated region fallthrough
CT: control target
= control target key end

     0   :  { %s146_s0 = inlined_call_operand.vmem [shape: bf16[2,32], index: 0, kind: input, shape index: {}]   ;;  %s147_s1 = inlined_call_operand.vmem [shape: bf16[32,128], index: 1, kind: input, shape index: {}]   ;;  %s148_s2 = inlined_call_operand.vmem [shape: f32[1,128], index: 2, kind: input, shape index: {}]   ;;  %s149_s3 = inlined_call_operand.hbm [shape: f32[2,128], index: 3, kind: output, shape index: {}]  }
   0x1   :  { %v81_v0 = vld [vmem:[%s147_s1 + $0x8] sm:$0xff] }
   0x2   :  { %8 = vsyncpa [#allocation3], 0  ;;  %47 = vmatpush.bf16.msra.mxu0 %v81_v0  ;;  %v80_v1 = vld [vmem:[%s147_s1] sm:$0xff]  ;;  %vm37_vm0 = vcmask 261120   ;;  %s110_s20 = smov [#allocation2]   ;;  %s62_s24 = sshll.u32 %s149_s3, 4  ;;  %s63_s24 = int_to_ptr.hbm [resolvable:$true] %s62_s24 }
   0x3   :  { %v16_v2 = vld [vmem:[%s146_s0] sm:$0x1]  ;;  %s60_s21 = sshll.u32 %s110_s20, 4  ;;  %s61_s21 = int_to_ptr.vmem [resolvable:$true] %s60_s21 }
   0x4   :  { %v83_v3 = vld [vmem:[%s148_s2] ss:$0 sm:$0xff] }
   0x6   :  { %48 = vmatpush.bf16.msra.mxu0 %v80_v1 }
   0x9   :  { %79 = vmatmul.msk.bf16.vlgmr.msra.gmra.mxu0 %vm37_vm0, %v16_v2 }
  0x86   :  { %v50_v4 = vpop.f32.mrf.mxu0 }
  0x87   :  { %v51_v5 = vadd.f32 %v83_v3, %v50_v4 }
  0x89   :  { %54 = vst [vmem:[#allocation2] sm:$0x3] %v51_v5 }
  0x8a   :  { %65 = dma.vmem_to_hbm [thread:$0]  %s61_s21, 32, %s63_s24, [#allocation3]  }
  0x8e   :  { %v52_v6 = vpop.f32.mrf.mxu0 }
  0x8f   :  { %108 = dma.done.wait [#allocation3], 32  }
  0x90   :  { %109 = vsyncadd [#allocation3], 4294967264 }
  0x91   :  { %70 = vsyncpa [#allocation3], 1 }

</bundles_post_ra>
